<compile_context>
chip_gen: v7x
topology: tpu7x:2x2x1
jax: 0.10.0
libtpu: 0.0.40
codegen_flags: <defaults>
</compile_context>

<pallas_src>
import functools

import jax
import jax.numpy as jnp
from jax import lax
from jax.experimental import pallas as pl
from jax.experimental.pallas import tpu as pltpu


def _init_block_kernel(planes_ref, w_ref, bias_ref, out_ref,
                       *, Cin, Cc, TH, Wo, Ho, H, W):
    # planes_ref : (4*Cin, Hh, Wo+1) parity planes of the current image (VMEM resident)
    # w_ref      : (Cc, 9*Cin)  conv weights with BN scale folded in
    # bias_ref   : (Cc, 1)      fused BN bias
    # out_ref    : (1, Cout, TH, Wo)  output block; channels [0:Cc]=conv, [Cc:]=pool
    r = pl.program_id(1)
    row0 = pl.multiple_of(r * TH, TH)

    # Row strip covering the TH output rows of this step (+1 row for ky=2).
    strip = planes_ref[:, pl.ds(row0, TH + 1), :]          # (4*Cin, TH+1, Wo+1)

    # The 9 stride-2 taps, each (Cin, TH, Wo), ordered (ky, kx, ci) to match w_ref.
    offs = [(ky, kx) for ky in range(3) for kx in range(3)]
    taps = []
    for ky, kx in offs:
        p = (ky % 2) * 2 + (kx % 2)                        # parity plane index
        dy, dx = ky // 2, kx // 2                          # +1 shifts for ky/kx == 2
        taps.append(strip[p * Cin:(p + 1) * Cin, dy:dy + TH, dx:dx + Wo])

    # ---- pool branch: max over the 9 taps, padded positions -> -inf -------------
    neg = jnp.array(-jnp.inf, dtype=strip.dtype)
    col_idx = lax.broadcasted_iota(jnp.int32, (Cin, TH, Wo), 2)
    row_idx = lax.broadcasted_iota(jnp.int32, (Cin, TH, Wo), 1) + row0
    pool = None
    for (ky, kx), tap in zip(offs, taps):
        if ky == 0:                                   # top padding row (ho == 0)
            tap = jnp.where(row_idx == 0, neg, tap)
        if ky == 2 and (H % 2 == 1):                  # bottom padding row (odd H)
            tap = jnp.where(row_idx == Ho - 1, neg, tap)
        if kx == 0:                                   # left padding column (wo == 0)
            tap = jnp.where(col_idx == 0, neg, tap)
        if kx == 2 and (W % 2 == 1):                  # right padding column (odd W)
            tap = jnp.where(col_idx == Wo - 1, neg, tap)
        pool = tap if pool is None else jnp.maximum(pool, tap)
    out_ref[0, Cc:Cc + Cin, :, :] = pool.astype(out_ref.dtype)

    # ---- conv branch: im2col matmul per output row + fused BN bias + ReLU -------
    patches = jnp.concatenate(taps, axis=0)                # (9*Cin, TH, Wo)
    wm = w_ref[...]                                        # (Cc, 9*Cin)
    bb = bias_ref[...]                                     # (Cc, 1)
    for t in range(TH):
        acc = jnp.dot(wm, patches[:, t, :],
                      preferred_element_type=jnp.float32)  # (Cc, Wo)
        acc = jnp.maximum(acc + bb, 0.0)                   # fused BN bias + ReLU
        out_ref[0, :Cc, t, :] = acc.astype(out_ref.dtype)


def modified_initial_block(x_nchw, w_oihw, bn_gamma, bn_beta, bn_mean, bn_var,
                           eps=1e-5, tile_rows=16, io_dtype=jnp.float32):
    N, Cin, H, W = x_nchw.shape
    Cc = w_oihw.shape[0]                       # out_channels - in_channels
    Cout = Cc + Cin
    Ho = (H + 2 - 3) // 2 + 1
    Wo = (W + 2 - 3) // 2 + 1

    # Row-strip tile: multiple of 8 (sublane tiling of the output block).
    tile_rows = max(8, (int(tile_rows) // 8) * 8)
    TH = min(tile_rows, ((Ho + 7) // 8) * 8)
    R = (Ho + TH - 1) // TH
    rows_pad = R * TH
    Hh = rows_pad + 1                          # parity-plane rows needed (ho + 1)
    Wh = Wo + 1                                # parity-plane cols needed (wo + 1)

    # Zero-pad once (conv semantics); pool padding handled by in-kernel -inf masks.
    xp = jnp.pad(x_nchw.astype(io_dtype), ((0, 0), (0, 0), (1, 1), (1, 1)))

    # Space-to-depth by 2: 4 parity planes, total ~1x the input bytes.
    def parity_plane(dy, dx):
        p = xp[:, :, dy::2, dx::2]
        p = p[:, :, :min(p.shape[2], Hh), :min(p.shape[3], Wh)]
        return jnp.pad(p, ((0, 0), (0, 0),
                           (0, Hh - p.shape[2]), (0, Wh - p.shape[3])))

    planes = jnp.stack([parity_plane(0, 0), parity_plane(0, 1),
                        parity_plane(1, 0), parity_plane(1, 1)], axis=1)
    planes = planes.reshape(N * 4 * Cin, Hh, Wh)           # (N*4*Cin, Hh, Wh)

    # Fold BatchNorm (eval) scale into the conv weights; bias added in-kernel.
    scale = bn_gamma / jnp.sqrt(bn_var + eps)              # (Cc,)
    bias = (bn_beta - bn_mean * scale).reshape(Cc, 1).astype(jnp.float32)
    wmat = (w_oihw * scale[:, None, None, None])           # (Cc, Cin, 3, 3)
    wmat = jnp.transpose(wmat, (0, 2, 3, 1)).reshape(Cc, 9 * Cin).astype(io_dtype)

    kernel = functools.partial(_init_block_kernel, Cin=Cin, Cc=Cc, TH=TH,
                               Wo=Wo, Ho=Ho, H=H, W=W)

    out = pl.pallas_call(
        kernel,
        out_shape=jax.ShapeDtypeStruct((N, Cout, rows_pad, Wo), io_dtype),
        grid_spec=pltpu.PrefetchScalarGridSpec(
            num_scalar_prefetch=0,
            grid=(N, R),
            in_specs=[
                # full per-image parity planes: DMA'd once per image, revisited over r
                pl.BlockSpec((4 * Cin, Hh, Wh), lambda n, r: (n, 0, 0)),
                pl.BlockSpec((Cc, 9 * Cin), lambda n, r: (0, 0)),
                pl.BlockSpec((Cc, 1), lambda n, r: (0, 0)),
            ],
            out_specs=pl.BlockSpec((1, Cout, TH, Wo), lambda n, r: (n, 0, r, 0)),
        ),
        compiler_params=pltpu.CompilerParams(
            dimension_semantics=("parallel", "parallel")),
    )(planes, wmat, bias)

    # Drop row padding (if any); layout is already NCHW.
    return out[:, :, :Ho, :]


def _reference(x, w, gamma, beta, mean, var, eps=1e-5):
    conv = lax.conv_general_dilated(
        x, w, window_strides=(2, 2), padding=((1, 1), (1, 1)),
        dimension_numbers=("NCHW", "OIHW", "NCHW"))
    s = gamma / jnp.sqrt(var + eps)
    b = beta - mean * s
    conv = jnp.maximum(conv * s[None, :, None, None] + b[None, :, None, None], 0.0)
    pooled = lax.reduce_window(
        x, -jnp.inf, lax.max, window_dimensions=(1, 1, 3, 3),
        window_strides=(1, 1, 2, 2),
        padding=((0, 0), (0, 0), (1, 1), (1, 1)))
    return jnp.concatenate([conv, pooled], axis=1)


if __name__ == "__main__":
    # Small shapes: in_channels=4, out_channels=8 (conv branch has 8-4=4 chans).
    N, Cin, H, W = 2, 4, 16, 16
    Cout_total = 8
    Cc = Cout_total - Cin

    key = jax.random.PRNGKey(0)
    kx, kw, kg, kb, km, kv = jax.random.split(key, 6)
    x = jax.random.normal(kx, (N, Cin, H, W), dtype=jnp.float32)
    w = 0.1 * jax.random.normal(kw, (Cc, Cin, 3, 3), dtype=jnp.float32)  # OIHW, no bias
    gamma = 1.0 + 0.1 * jax.random.normal(kg, (Cc,), dtype=jnp.float32)
    beta = 0.1 * jax.random.normal(kb, (Cc,), dtype=jnp.float32)
    mean = 0.1 * jax.random.normal(km, (Cc,), dtype=jnp.float32)
    var = jax.random.uniform(kv, (Cc,), minval=0.5, maxval=1.5, dtype=jnp.float32)

    out = modified_initial_block(x, w, gamma, beta, mean, var)
    out = jax.block_until_ready(out)

    ref = _reference(x, w, gamma, beta, mean, var)
    assert out.shape == (N, Cout_total, H // 2, W // 2), out.shape
    assert jnp.allclose(out, ref, rtol=1e-4, atol=1e-4), float(jnp.max(jnp.abs(out - ref)))

    print("KERNEL_OK")
</pallas_src>

<mosaic_0001>
module attributes {stable_mosaic.version = 11 : i64} {
  func.func @_init_block_kernel(%arg0: i32, %arg1: i32, %arg2: memref<16x9x9xf32, #tpu.memory_space<vmem>>, %arg3: memref<4x36xf32, #tpu.memory_space<vmem>>, %arg4: memref<4x1xf32, #tpu.memory_space<vmem>>, %arg5: memref<1x8x8x8xf32, #tpu.memory_space<vmem>>) attributes {dimension_semantics = [#tpu.dimension_semantics<parallel>, #tpu.dimension_semantics<parallel>], iteration_bounds = array<i64: 2, 1>, scalar_prefetch = 0 : i64, scratch_operands = 0 : i64, tpu.core_type = #tpu.core_type<tc>, window_params = [{transform_indices = @transform_0, window_bounds = array<i64: 16, 9, 9>}, {pipeline_mode = #tpu.pipeline_mode<synchronous>, transform_indices = @transform_1, window_bounds = array<i64: 4, 36>}, {pipeline_mode = #tpu.pipeline_mode<synchronous>, transform_indices = @transform_2, window_bounds = array<i64: 4, 1>}, {transform_indices = @transform_3, window_bounds = array<i64: 1, 8, 8, 8>}]} {
    %c8_i32 = arith.constant 8 : i32
    %0 = arith.muli %arg1, %c8_i32 : i32
    %1 = tpu.assume_multiple %0, 8 : i32
    %c0 = arith.constant 0 : index
    %2 = arith.index_cast %1 : i32 to index
    %c0_0 = arith.constant 0 : index
    %3 = vector.load %arg2[%c0, %2, %c0_0] : memref<16x9x9xf32, #tpu.memory_space<vmem>>, vector<16x9x9xf32>
    %4 = vector.extract_strided_slice %3 {offsets = [0, 0, 0], sizes = [4, 8, 8], strides = [1, 1, 1]} : vector<16x9x9xf32> to vector<4x8x8xf32>
    %5 = vector.extract_strided_slice %3 {offsets = [4, 0, 0], sizes = [4, 8, 8], strides = [1, 1, 1]} : vector<16x9x9xf32> to vector<4x8x8xf32>
    %6 = vector.extract_strided_slice %3 {offsets = [0, 0, 1], sizes = [4, 8, 8], strides = [1, 1, 1]} : vector<16x9x9xf32> to vector<4x8x8xf32>
    %7 = vector.extract_strided_slice %3 {offsets = [8, 0, 0], sizes = [4, 8, 8], strides = [1, 1, 1]} : vector<16x9x9xf32> to vector<4x8x8xf32>
    %8 = vector.extract_strided_slice %3 {offsets = [12, 0, 0], sizes = [4, 8, 8], strides = [1, 1, 1]} : vector<16x9x9xf32> to vector<4x8x8xf32>
    %9 = vector.extract_strided_slice %3 {offsets = [8, 0, 1], sizes = [4, 8, 8], strides = [1, 1, 1]} : vector<16x9x9xf32> to vector<4x8x8xf32>
    %10 = vector.extract_strided_slice %3 {offsets = [0, 1, 0], sizes = [4, 8, 8], strides = [1, 1, 1]} : vector<16x9x9xf32> to vector<4x8x8xf32>
    %11 = vector.extract_strided_slice %3 {offsets = [4, 1, 0], sizes = [4, 8, 8], strides = [1, 1, 1]} : vector<16x9x9xf32> to vector<4x8x8xf32>
    %12 = vector.extract_strided_slice %3 {offsets = [0, 1, 1], sizes = [4, 8, 8], strides = [1, 1, 1]} : vector<16x9x9xf32> to vector<4x8x8xf32>
    %13 = tpu.iota {dimensions = array<i32: 2>} : vector<4x8x8xi32>
    %14 = tpu.iota {dimensions = array<i32: 1>} : vector<4x8x8xi32>
    %15 = vector.broadcast %1 : i32 to vector<4x8x8xi32>
    %16 = arith.addi %14, %15 : vector<4x8x8xi32>
    %c0_i32 = arith.constant 0 : i32
    %17 = vector.broadcast %c0_i32 : i32 to vector<4x8x8xi32>
    %18 = arith.cmpi eq, %16, %17 : vector<4x8x8xi32>
    %cst = arith.constant 0xFF800000 : f32
    %19 = vector.broadcast %cst : f32 to vector<4x8x8xf32>
    %20 = arith.select %18, %19, %4 : vector<4x8x8xi1>, vector<4x8x8xf32>
    %c0_i32_1 = arith.constant 0 : i32
    %21 = vector.broadcast %c0_i32_1 : i32 to vector<4x8x8xi32>
    %22 = arith.cmpi eq, %13, %21 : vector<4x8x8xi32>
    %cst_2 = arith.constant 0xFF800000 : f32
    %23 = vector.broadcast %cst_2 : f32 to vector<4x8x8xf32>
    %24 = arith.select %22, %23, %20 : vector<4x8x8xi1>, vector<4x8x8xf32>
    %c0_i32_3 = arith.constant 0 : i32
    %25 = vector.broadcast %c0_i32_3 : i32 to vector<4x8x8xi32>
    %26 = arith.cmpi eq, %16, %25 : vector<4x8x8xi32>
    %cst_4 = arith.constant 0xFF800000 : f32
    %27 = vector.broadcast %cst_4 : f32 to vector<4x8x8xf32>
    %28 = arith.select %26, %27, %5 : vector<4x8x8xi1>, vector<4x8x8xf32>
    %29 = arith.maximumf %24, %28 : vector<4x8x8xf32>
    %c0_i32_5 = arith.constant 0 : i32
    %30 = vector.broadcast %c0_i32_5 : i32 to vector<4x8x8xi32>
    %31 = arith.cmpi eq, %16, %30 : vector<4x8x8xi32>
    %cst_6 = arith.constant 0xFF800000 : f32
    %32 = vector.broadcast %cst_6 : f32 to vector<4x8x8xf32>
    %33 = arith.select %31, %32, %6 : vector<4x8x8xi1>, vector<4x8x8xf32>
    %34 = arith.maximumf %29, %33 : vector<4x8x8xf32>
    %c0_i32_7 = arith.constant 0 : i32
    %35 = vector.broadcast %c0_i32_7 : i32 to vector<4x8x8xi32>
    %36 = arith.cmpi eq, %13, %35 : vector<4x8x8xi32>
    %cst_8 = arith.constant 0xFF800000 : f32
    %37 = vector.broadcast %cst_8 : f32 to vector<4x8x8xf32>
    %38 = arith.select %36, %37, %7 : vector<4x8x8xi1>, vector<4x8x8xf32>
    %39 = arith.maximumf %34, %38 : vector<4x8x8xf32>
    %40 = arith.maximumf %39, %8 : vector<4x8x8xf32>
    %41 = arith.maximumf %40, %9 : vector<4x8x8xf32>
    %c0_i32_9 = arith.constant 0 : i32
    %42 = vector.broadcast %c0_i32_9 : i32 to vector<4x8x8xi32>
    %43 = arith.cmpi eq, %13, %42 : vector<4x8x8xi32>
    %cst_10 = arith.constant 0xFF800000 : f32
    %44 = vector.broadcast %cst_10 : f32 to vector<4x8x8xf32>
    %45 = arith.select %43, %44, %10 : vector<4x8x8xi1>, vector<4x8x8xf32>
    %46 = arith.maximumf %41, %45 : vector<4x8x8xf32>
    %47 = arith.maximumf %46, %11 : vector<4x8x8xf32>
    %48 = arith.maximumf %47, %12 : vector<4x8x8xf32>
    %c0_11 = arith.constant 0 : index
    %c4 = arith.constant 4 : index
    %c0_12 = arith.constant 0 : index
    %c0_13 = arith.constant 0 : index
    %49 = vector.load %arg5[%c0_11, %c4, %c0_12, %c0_13] : memref<1x8x8x8xf32, #tpu.memory_space<vmem>>, vector<1x4x8x8xf32>
    %50 = vector.shape_cast %49 : vector<1x4x8x8xf32> to vector<4x8x8xf32>
    %51 = vector.shape_cast %48 : vector<4x8x8xf32> to vector<1x4x8x8xf32>
    tpu.vector_store %arg5[%c0_11, %c4, %c0_12, %c0_13], %51 {strides = array<i32>} : memref<1x8x8x8xf32, #tpu.memory_space<vmem>>, vector<1x4x8x8xf32>,
    %52 = tpu.concatenate %4, %5, %6, %7, %8, %9, %10, %11, %12 in 0 : vector<4x8x8xf32>, vector<4x8x8xf32>, vector<4x8x8xf32>, vector<4x8x8xf32>, vector<4x8x8xf32>, vector<4x8x8xf32>, vector<4x8x8xf32>, vector<4x8x8xf32>, vector<4x8x8xf32> -> vector<36x8x8xf32>
    %c0_14 = arith.constant 0 : index
    %c0_15 = arith.constant 0 : index
    %53 = vector.load %arg3[%c0_14, %c0_15] : memref<4x36xf32, #tpu.memory_space<vmem>>, vector<4x36xf32>
    %c0_16 = arith.constant 0 : index
    %c0_17 = arith.constant 0 : index
    %54 = vector.load %arg4[%c0_16, %c0_17] : memref<4x1xf32, #tpu.memory_space<vmem>>, vector<4x1xf32>
    %55 = vector.extract_strided_slice %52 {offsets = [0, 0, 0], sizes = [36, 1, 8], strides = [1, 1, 1]} : vector<36x8x8xf32> to vector<36x1x8xf32>
    %56 = vector.shape_cast %55 : vector<36x1x8xf32> to vector<36x8xf32>
    %cst_18 = arith.constant dense<0.000000e+00> : vector<4x8xf32>
    %57 = tpu.matmul %53, %56, %cst_18 {dimension_numbers = #tpu.dot_dimension_numbers<[1], [0], [0], [1], [0, 0, 1, 1], [], []>} : vector<4x36xf32>, vector<36x8xf32>, vector<4x8xf32> -> vector<4x8xf32>
    %58 = vector.broadcast %54 : vector<4x1xf32> to vector<4x8xf32>
    %59 = arith.addf %57, %58 : vector<4x8xf32>
    %cst_19 = arith.constant 0.000000e+00 : f32
    %60 = vector.broadcast %cst_19 : f32 to vector<4x8xf32>
    %61 = arith.maximumf %59, %60 : vector<4x8xf32>
    %c0_20 = arith.constant 0 : index
    %c0_21 = arith.constant 0 : index
    %c0_22 = arith.constant 0 : index
    %c0_23 = arith.constant 0 : index
    %62 = vector.load %arg5[%c0_20, %c0_21, %c0_22, %c0_23] : memref<1x8x8x8xf32, #tpu.memory_space<vmem>>, vector<1x4x1x8xf32>
    %63 = vector.shape_cast %62 : vector<1x4x1x8xf32> to vector<4x8xf32>
    %64 = vector.shape_cast %61 : vector<4x8xf32> to vector<1x4x1x8xf32>
    tpu.vector_store %arg5[%c0_20, %c0_21, %c0_22, %c0_23], %64 {strides = array<i32>} : memref<1x8x8x8xf32, #tpu.memory_space<vmem>>, vector<1x4x1x8xf32>,
    %65 = vector.extract_strided_slice %52 {offsets = [0, 1, 0], sizes = [36, 1, 8], strides = [1, 1, 1]} : vector<36x8x8xf32> to vector<36x1x8xf32>
    %66 = vector.shape_cast %65 : vector<36x1x8xf32> to vector<36x8xf32>
    %cst_24 = arith.constant dense<0.000000e+00> : vector<4x8xf32>
    %67 = tpu.matmul %53, %66, %cst_24 {dimension_numbers = #tpu.dot_dimension_numbers<[1], [0], [0], [1], [0, 0, 1, 1], [], []>} : vector<4x36xf32>, vector<36x8xf32>, vector<4x8xf32> -> vector<4x8xf32>
    %68 = vector.broadcast %54 : vector<4x1xf32> to vector<4x8xf32>
    %69 = arith.addf %67, %68 : vector<4x8xf32>
    %cst_25 = arith.constant 0.000000e+00 : f32
    %70 = vector.broadcast %cst_25 : f32 to vector<4x8xf32>
    %71 = arith.maximumf %69, %70 : vector<4x8xf32>
    %c0_26 = arith.constant 0 : index
    %c0_27 = arith.constant 0 : index
    %c1 = arith.constant 1 : index
    %c0_28 = arith.constant 0 : index
    %72 = vector.load %arg5[%c0_26, %c0_27, %c1, %c0_28] : memref<1x8x8x8xf32, #tpu.memory_space<vmem>>, vector<1x4x1x8xf32>
    %73 = vector.shape_cast %72 : vector<1x4x1x8xf32> to vector<4x8xf32>
    %74 = vector.shape_cast %71 : vector<4x8xf32> to vector<1x4x1x8xf32>
    tpu.vector_store %arg5[%c0_26, %c0_27, %c1, %c0_28], %74 {strides = array<i32>} : memref<1x8x8x8xf32, #tpu.memory_space<vmem>>, vector<1x4x1x8xf32>,
    %75 = vector.extract_strided_slice %52 {offsets = [0, 2, 0], sizes = [36, 1, 8], strides = [1, 1, 1]} : vector<36x8x8xf32> to vector<36x1x8xf32>
    %76 = vector.shape_cast %75 : vector<36x1x8xf32> to vector<36x8xf32>
    %cst_29 = arith.constant dense<0.000000e+00> : vector<4x8xf32>
    %77 = tpu.matmul %53, %76, %cst_29 {dimension_numbers = #tpu.dot_dimension_numbers<[1], [0], [0], [1], [0, 0, 1, 1], [], []>} : vector<4x36xf32>, vector<36x8xf32>, vector<4x8xf32> -> vector<4x8xf32>
    %78 = vector.broadcast %54 : vector<4x1xf32> to vector<4x8xf32>
    %79 = arith.addf %77, %78 : vector<4x8xf32>
    %cst_30 = arith.constant 0.000000e+00 : f32
    %80 = vector.broadcast %cst_30 : f32 to vector<4x8xf32>
    %81 = arith.maximumf %79, %80 : vector<4x8xf32>
    %c0_31 = arith.constant 0 : index
    %c0_32 = arith.constant 0 : index
    %c2 = arith.constant 2 : index
    %c0_33 = arith.constant 0 : index
    %82 = vector.load %arg5[%c0_31, %c0_32, %c2, %c0_33] : memref<1x8x8x8xf32, #tpu.memory_space<vmem>>, vector<1x4x1x8xf32>
    %83 = vector.shape_cast %82 : vector<1x4x1x8xf32> to vector<4x8xf32>
    %84 = vector.shape_cast %81 : vector<4x8xf32> to vector<1x4x1x8xf32>
    tpu.vector_store %arg5[%c0_31, %c0_32, %c2, %c0_33], %84 {strides = array<i32>} : memref<1x8x8x8xf32, #tpu.memory_space<vmem>>, vector<1x4x1x8xf32>,
    %85 = vector.extract_strided_slice %52 {offsets = [0, 3, 0], sizes = [36, 1, 8], strides = [1, 1, 1]} : vector<36x8x8xf32> to vector<36x1x8xf32>
    %86 = vector.shape_cast %85 : vector<36x1x8xf32> to vector<36x8xf32>
    %cst_34 = arith.constant dense<0.000000e+00> : vector<4x8xf32>
    %87 = tpu.matmul %53, %86, %cst_34 {dimension_numbers = #tpu.dot_dimension_numbers<[1], [0], [0], [1], [0, 0, 1, 1], [], []>} : vector<4x36xf32>, vector<36x8xf32>, vector<4x8xf32> -> vector<4x8xf32>
    %88 = vector.broadcast %54 : vector<4x1xf32> to vector<4x8xf32>
    %89 = arith.addf %87, %88 : vector<4x8xf32>
    %cst_35 = arith.constant 0.000000e+00 : f32
    %90 = vector.broadcast %cst_35 : f32 to vector<4x8xf32>
    %91 = arith.maximumf %89, %90 : vector<4x8xf32>
    %c0_36 = arith.constant 0 : index
    %c0_37 = arith.constant 0 : index
    %c3 = arith.constant 3 : index
    %c0_38 = arith.constant 0 : index
    %92 = vector.load %arg5[%c0_36, %c0_37, %c3, %c0_38] : memref<1x8x8x8xf32, #tpu.memory_space<vmem>>, vector<1x4x1x8xf32>
    %93 = vector.shape_cast %92 : vector<1x4x1x8xf32> to vector<4x8xf32>
    %94 = vector.shape_cast %91 : vector<4x8xf32> to vector<1x4x1x8xf32>
    tpu.vector_store %arg5[%c0_36, %c0_37, %c3, %c0_38], %94 {strides = array<i32>} : memref<1x8x8x8xf32, #tpu.memory_space<vmem>>, vector<1x4x1x8xf32>,
    %95 = vector.extract_strided_slice %52 {offsets = [0, 4, 0], sizes = [36, 1, 8], strides = [1, 1, 1]} : vector<36x8x8xf32> to vector<36x1x8xf32>
    %96 = vector.shape_cast %95 : vector<36x1x8xf32> to vector<36x8xf32>
    %cst_39 = arith.constant dense<0.000000e+00> : vector<4x8xf32>
    %97 = tpu.matmul %53, %96, %cst_39 {dimension_numbers = #tpu.dot_dimension_numbers<[1], [0], [0], [1], [0, 0, 1, 1], [], []>} : vector<4x36xf32>, vector<36x8xf32>, vector<4x8xf32> -> vector<4x8xf32>
    %98 = vector.broadcast %54 : vector<4x1xf32> to vector<4x8xf32>
    %99 = arith.addf %97, %98 : vector<4x8xf32>
    %cst_40 = arith.constant 0.000000e+00 : f32
    %100 = vector.broadcast %cst_40 : f32 to vector<4x8xf32>
    %101 = arith.maximumf %99, %100 : vector<4x8xf32>
    %c0_41 = arith.constant 0 : index
    %c0_42 = arith.constant 0 : index
    %c4_43 = arith.constant 4 : index
    %c0_44 = arith.constant 0 : index
    %102 = vector.load %arg5[%c0_41, %c0_42, %c4_43, %c0_44] : memref<1x8x8x8xf32, #tpu.memory_space<vmem>>, vector<1x4x1x8xf32>
    %103 = vector.shape_cast %102 : vector<1x4x1x8xf32> to vector<4x8xf32>
    %104 = vector.shape_cast %101 : vector<4x8xf32> to vector<1x4x1x8xf32>
    tpu.vector_store %arg5[%c0_41, %c0_42, %c4_43, %c0_44], %104 {strides = array<i32>} : memref<1x8x8x8xf32, #tpu.memory_space<vmem>>, vector<1x4x1x8xf32>,
    %105 = vector.extract_strided_slice %52 {offsets = [0, 5, 0], sizes = [36, 1, 8], strides = [1, 1, 1]} : vector<36x8x8xf32> to vector<36x1x8xf32>
    %106 = vector.shape_cast %105 : vector<36x1x8xf32> to vector<36x8xf32>
    %cst_45 = arith.constant dense<0.000000e+00> : vector<4x8xf32>
    %107 = tpu.matmul %53, %106, %cst_45 {dimension_numbers = #tpu.dot_dimension_numbers<[1], [0], [0], [1], [0, 0, 1, 1], [], []>} : vector<4x36xf32>, vector<36x8xf32>, vector<4x8xf32> -> vector<4x8xf32>
    %108 = vector.broadcast %54 : vector<4x1xf32> to vector<4x8xf32>
    %109 = arith.addf %107, %108 : vector<4x8xf32>
    %cst_46 = arith.constant 0.000000e+00 : f32
    %110 = vector.broadcast %cst_46 : f32 to vector<4x8xf32>
    %111 = arith.maximumf %109, %110 : vector<4x8xf32>
    %c0_47 = arith.constant 0 : index
    %c0_48 = arith.constant 0 : index
    %c5 = arith.constant 5 : index
    %c0_49 = arith.constant 0 : index
    %112 = vector.load %arg5[%c0_47, %c0_48, %c5, %c0_49] : memref<1x8x8x8xf32, #tpu.memory_space<vmem>>, vector<1x4x1x8xf32>
    %113 = vector.shape_cast %112 : vector<1x4x1x8xf32> to vector<4x8xf32>
    %114 = vector.shape_cast %111 : vector<4x8xf32> to vector<1x4x1x8xf32>
    tpu.vector_store %arg5[%c0_47, %c0_48, %c5, %c0_49], %114 {strides = array<i32>} : memref<1x8x8x8xf32, #tpu.memory_space<vmem>>, vector<1x4x1x8xf32>,
    %115 = vector.extract_strided_slice %52 {offsets = [0, 6, 0], sizes = [36, 1, 8], strides = [1, 1, 1]} : vector<36x8x8xf32> to vector<36x1x8xf32>
    %116 = vector.shape_cast %115 : vector<36x1x8xf32> to vector<36x8xf32>
    %cst_50 = arith.constant dense<0.000000e+00> : vector<4x8xf32>
    %117 = tpu.matmul %53, %116, %cst_50 {dimension_numbers = #tpu.dot_dimension_numbers<[1], [0], [0], [1], [0, 0, 1, 1], [], []>} : vector<4x36xf32>, vector<36x8xf32>, vector<4x8xf32> -> vector<4x8xf32>
    %118 = vector.broadcast %54 : vector<4x1xf32> to vector<4x8xf32>
    %119 = arith.addf %117, %118 : vector<4x8xf32>
    %cst_51 = arith.constant 0.000000e+00 : f32
    %120 = vector.broadcast %cst_51 : f32 to vector<4x8xf32>
    %121 = arith.maximumf %119, %120 : vector<4x8xf32>
    %c0_52 = arith.constant 0 : index
    %c0_53 = arith.constant 0 : index
    %c6 = arith.constant 6 : index
    %c0_54 = arith.constant 0 : index
    %122 = vector.load %arg5[%c0_52, %c0_53, %c6, %c0_54] : memref<1x8x8x8xf32, #tpu.memory_space<vmem>>, vector<1x4x1x8xf32>
    %123 = vector.shape_cast %122 : vector<1x4x1x8xf32> to vector<4x8xf32>
    %124 = vector.shape_cast %121 : vector<4x8xf32> to vector<1x4x1x8xf32>
    tpu.vector_store %arg5[%c0_52, %c0_53, %c6, %c0_54], %124 {strides = array<i32>} : memref<1x8x8x8xf32, #tpu.memory_space<vmem>>, vector<1x4x1x8xf32>,
    %125 = vector.extract_strided_slice %52 {offsets = [0, 7, 0], sizes = [36, 1, 8], strides = [1, 1, 1]} : vector<36x8x8xf32> to vector<36x1x8xf32>
    %126 = vector.shape_cast %125 : vector<36x1x8xf32> to vector<36x8xf32>
    %cst_55 = arith.constant dense<0.000000e+00> : vector<4x8xf32>
    %127 = tpu.matmul %53, %126, %cst_55 {dimension_numbers = #tpu.dot_dimension_numbers<[1], [0], [0], [1], [0, 0, 1, 1], [], []>} : vector<4x36xf32>, vector<36x8xf32>, vector<4x8xf32> -> vector<4x8xf32>
    %128 = vector.broadcast %54 : vector<4x1xf32> to vector<4x8xf32>
    %129 = arith.addf %127, %128 : vector<4x8xf32>
    %cst_56 = arith.constant 0.000000e+00 : f32
    %130 = vector.broadcast %cst_56 : f32 to vector<4x8xf32>
    %131 = arith.maximumf %129, %130 : vector<4x8xf32>
    %c0_57 = arith.constant 0 : index
    %c0_58 = arith.constant 0 : index
    %c7 = arith.constant 7 : index
    %c0_59 = arith.constant 0 : index
    %132 = vector.load %arg5[%c0_57, %c0_58, %c7, %c0_59] : memref<1x8x8x8xf32, #tpu.memory_space<vmem>>, vector<1x4x1x8xf32>
    %133 = vector.shape_cast %132 : vector<1x4x1x8xf32> to vector<4x8xf32>
    %134 = vector.shape_cast %131 : vector<4x8xf32> to vector<1x4x1x8xf32>
    tpu.vector_store %arg5[%c0_57, %c0_58, %c7, %c0_59], %134 {strides = array<i32>} : memref<1x8x8x8xf32, #tpu.memory_space<vmem>>, vector<1x4x1x8xf32>,
    return
  }
  func.func @transform_0(%arg0: i32, %arg1: i32) -> (i32, i32, i32) {
    %c0_i32 = arith.constant 0 : i32
    %c0_i32_0 = arith.constant 0 : i32
    %c0_i32_1 = arith.constant 0 : i32
    return %arg0, %c0_i32, %c0_i32_0 : i32, i32, i32
  }
  func.func @transform_1(%arg0: i32, %arg1: i32) -> (i32, i32) {
    %c0_i32 = arith.constant 0 : i32
    %c0_i32_0 = arith.constant 0 : i32
    %c0_i32_1 = arith.constant 0 : i32
    return %c0_i32, %c0_i32_0 : i32, i32
  }
  func.func @transform_2(%arg0: i32, %arg1: i32) -> (i32, i32) {
    %c0_i32 = arith.constant 0 : i32
    %c0_i32_0 = arith.constant 0 : i32
    %c0_i32_1 = arith.constant 0 : i32
    return %c0_i32, %c0_i32_0 : i32, i32
  }
  func.func @transform_3(%arg0: i32, %arg1: i32) -> (i32, i32, i32, i32) {
    %c0_i32 = arith.constant 0 : i32
    %c0_i32_0 = arith.constant 0 : i32
    %c0_i32_1 = arith.constant 0 : i32
    return %arg0, %c0_i32, %arg1, %c0_i32_0 : i32, i32, i32, i32
  }
}

</mosaic_0001>

<bundles_post_ra>
// kernel: tpu_custom_call.1
= control target key start
LH: loop header
LB: loop body
LE: loop exit
PB: predicated region body
PF: predicated region fallthrough
CT: control target
= control target key end

     0   :  { %8 = vsyncpa [#allocation3], 0  ;;  %s3628_s0 = inlined_call_operand.vmem [shape: f32[32,9,9], index: 0, kind: input, shape index: {}]   ;;  %s3629_s1 = inlined_call_operand.vmem [shape: f32[4,36], index: 1, kind: input, shape index: {}]   ;;  %s3630_s2 = inlined_call_operand.vmem [shape: f32[4,1], index: 2, kind: input, shape index: {}]   ;;  %s3631_s3 = inlined_call_operand.hbm [shape: f32[2,8,8,8], index: 3, kind: output, shape index: {}]  }
   0x1   :  { %10 = vsyncpa [#allocation3 + $0x1], 0  ;;  %s2313_s12 = smov 0   ;;  %s2315_s13 = smov 0  }
   0x2   :  { %s2317_s14 = smov 0   ;;  %s2319_s15 = smov 0  }
   0x3   :  { %s2321_s16 = smov 0   ;;  %s2323_s17 = smov 0  }
   0x4 LB: > { %s1890_s18 = sadd.s32 4294967295, %s2282_s17   ;;  %s1891_s19 = sadd.s32 4294967294, %s2282_s17   ;;  %s2282_s17 = sphi %s2323_s17, %s16_s17   ;;  %s2278_s16 = sphi %s2321_s16, %s3730_s16   ;;  %s2274_s15 = sphi %s2319_s15, %s3729_s15   ;;  %s2270_s14 = sphi %s2317_s14, %s3728_s14   ;;  %s2266_s13 = sphi %s2315_s13, %s3727_s13   ;;  %s2262_s12 = sphi %s2313_s12, %s3726_s12  }
   0x5   : > { %s28_s20 = sadd.s32 1, %s2278_s16  ;;  %s105_s21 = sadd.s32 1, %s2270_s14 }
   0x6   : > { %p30_p0 = scmp.ge.s32.totalorder %s28_s20, 2  ;;  %p115_p1 = scmp.ne.s32.totalorder %s2270_s14, %s2266_s13 }
   0x7   : > { %p116_p2 = scmp.eq.s32.totalorder %s1890_s18, 1  ;;  %p121_p3 = scmp.ne.s32.totalorder %s2266_s13, %s2262_s12 }
   0x8   : > { %s3732_s20 = smov (%p30_p0, %s28_s20), 0  ;;  %p122_p5 = scmp.eq.s32.totalorder %s1891_s19, 1 }
   0x9   : > { %p2353_p4 = por %p116_p2, %p115_p1  ;;  %s100_s23 = ssub.s32 %s2278_s16, %s3732_s20 }
   0xa   : > { %p1894_p6 = scmp.ge.s32.totalorder %s2282_s17, 1  ;;  %p103_p7 = scmp.eq.s32.totalorder %s100_s23, 0 }
   0xb   : > { %p2360_p8 = por %p122_p5, %p121_p3  ;;  %p156_p9 = scmp.lt.s32.totalorder %s2282_s17, 3 }
   0xc   : > { %s2366_s25 = scalar_select %p103_p7, %s2270_s14, %s105_s21  }
   0xd   : > { %p157_p10 = pnand %p1894_p6, %p156_p9 }
   0xf   : > { %160 = sbr.rel (%p157_p10) target bundleno = 462 (0x1ce), region = 32 }
  0x16   : > { %s1896_s26 = sshll.u32 %s2274_s15, 4  ;;  %v214_v0 = vlaneseq  ;;  %v2284_v1 = vmov 0   ;;  %s2285_s4 = smov 127   ;;  %vm306_vm2 = vcmask 1046528   ;;  %v3634_v28 = vmov 0.0|0.0  }
  0x17   : > { %p182_p11 = scmp.lt.s32.totalorder %s1896_s26, 31  ;;  %2199 = vset.pattern.permute.xlu0 %v2284_v1  ;;  %2078 = vmatprep.subr.bf16.mxu0 %v3634_v28  ;;  %vm417_vm3 = vcmask 1041409   ;;  %vm420_vm4 = vcmask 1042434   ;;  %vm423_vm5 = vcmask 1043459   ;;  %vm426_vm6 = vcmask 1044484   ;;  %s178_s9 = sand.u32 1, %s2266_s13  }
  0x18   : > { %v2369_v2 = vshrl.u32 %v214_v0, 7  ;;  %v2371_v3 = vand.u32 127, %v214_v0  ;;  %2084 = vmatprep.subr.bf16.mxu1 %v3634_v28  ;;  %vm429_vm7 = vcmask 1045509   ;;  %vm432_vm8 = vcmask 1046534   ;;  %s3234_s10 = sshll.u32 %s178_s9, 6  ;;  %s1925_s18 = sshll.u32 %s2274_s15, 10 }
  0x19   : > { %s3734_s26 = smov (!%p182_p11, %s1896_s26), 31  ;;  %vm434_vm9 = vcmask 1047559   ;;  %vm2287_vm10 = vmmov 0   ;;  %vm492_vm11 = vcmask 1043456   ;;  %vm488_vm12 = vcmask 293888   ;;  %s3273_s11 = scalar_lea.vmem [#allocation2], %s3234_s10 }
  0x1a   : > { %3647 = vst [vmem:[#allocation5_spill] sm:$0xff] %v2369_v2  ;;  %s1924_s27 = sshll.u32 %s3734_s26, 4  ;;  %vm220_vm0 = vcmp.eq.s32.totalorder %v2369_v2, 0  ;;  %vm225_vm1 = vcmp.eq.s32.totalorder %v2371_v3, 0  ;;  %vm392_vm13 = vcmask 64512   ;;  %vm595_vm14 = vcmask 57344   ;;  %s3568_s26 = scalar_lea.hbm %s3631_s3, %s1925_s18 }
  0x1b   : > { %s2376_s30 = scalar_lea.vmem %s3628_s0, %s1924_s27  ;;  %s1816_s19 = sshll.u32 %s3273_s11, 4  ;;  %s3570_s19 = int_to_ptr.vmem [resolvable:$true] %s1816_s19 }
  0x1c   : > { %v2380_v4 = vld [vmem:[%s2376_s30 + $0x80] sm:$0xff]  ;;  %v2386_v6 = vld [vmem:[%s2376_s30 + $0x10] sm:$0xff]  ;;  %v2411_v13 = vld [vmem:[%s2376_s30 + $0x18] sm:$0x1]  ;;  %s3582_s15 = scalar_lea.sflag [#allocation3], %s178_s9  ;;  %s2204_s27 = scalar_lea.vmem %s3570_s19, 1024 }
  0x1d   : > { %v2383_v5 = vld [vmem:[%s2376_s30] sm:$0xff]  ;;  %274 = vrot.lane.b32.xlu1 %v2380_v4, %s2285_s4  ;;  %v2397_v9 = vld [vmem:[%s2376_s30 + $0x30] sm:$0xff]  ;;  %v2421_v15 = vsel %vm220_vm0, -inf, %v2386_v6  ;;  %v366_v18 = vrot.slane %v2386_v6, 1  ;;  %v191_v19 = vld [vmem:[%s2376_s30 + $0x8] sm:$0x1]  ;;  %p2205_p12 = scmp.ne.s32.totalorder %s3570_s19, %s2204_s27 }
  0x1e   : > { %v2189_v7 = vpack.i.bf16 %v2386_v6, %v2383_v5  ;;  %v2394_v8 = vld [vmem:[%s2376_s30 + $0x20] sm:$0xff]  ;;  %v2400_v10 = vld [vmem:[%s2376_s30 + $0x90] sm:$0xff]  ;;  %v2405_v11 = vsel %vm220_vm0, -inf, %v2383_v5  ;;  %v2426_v16 = vsel %vm220_vm0, -inf, %v2397_v9  ;;  %v2438_v20 = vsel %vm225_vm1, -inf, %v2421_v15  ;;  %s2290_s28 = smov [#allocation2]  }
  0x1f   : > { %v2194_v12 = vpack.i.bf16 %v2397_v9, %v2394_v8  ;;  %v2416_v14 = vsel %vm225_vm1, -inf, %v2405_v11  ;;  %v2431_v17 = vld [vmem:[%s2376_s30 + $0xb0] sm:$0xff]  ;;  %v2443_v21 = vsel %vm225_vm1, -inf, %v2426_v16  ;;  %v367_v22 = vrot.slane %v2411_v13, 1  ;;  %v205_v25 = vld [vmem:[%s2376_s30 + $0x78] sm:$0x1]  ;;  %p2206_p13 = pnand %p2205_p12, %p2353_p4 }
  0x20   : > { %2190 = vrot.lane.b32.xlu0 %v2189_v7, %s2285_s4  ;;  %v2449_v23 = vsel %vm220_vm0, -inf, %v2394_v8  ;;  %v2452_v24 = vld [vmem:[%s2376_s30 + $0x70] sm:$0xff]  ;;  %v2457_v26 = vld [vmem:[%s2376_s30 + $0x38] sm:$0x1]  ;;  %v345_v30 = vrot.slane %v205_v25, 1  ;;  %v2467_v31 = vld [vmem:[%s2376_s30 + $0xa0] sm:$0xff] }
  0x21   : > { %276 = vrot.lane.b32.xlu1 %v2400_v10, %s2285_s4  ;;  %v2462_v27 = vsel %vm225_vm1, -inf, %v2449_v23  ;;  %v3639_v29 = vrot.slane %v2452_v24, 1  ;;  %v363_v32 = vrot.slane %v2383_v5, 1  ;;  %v364_v33 = vrot.slane %v191_v19, 1  ;;  %v2474_v34 = vld [vmem:[%s2376_s30 + $0x28] sm:$0x1]  ;;  %p2207_p0 = pneg %p2206_p13 }
  0x22   : > { %3648 = vst [vmem:[#allocation6_spill] sm:$0xff] %v2462_v27  ;;  %v2484_v36 = vsel %vm306_vm2, %v366_v18, %v367_v22  ;;  %v372_v37 = vrot.slane %v2397_v9, 1  ;;  %v373_v38 = vrot.slane %v2457_v26, 1  ;;  %v2489_v39 = vld [vmem:[%s2376_s30 + $0x40] sm:$0xff]  ;;  %v2496_v41 = vld [vmem:[%s2376_s30 + $0x50] sm:$0xff]  ;;  %v601_v42 = vrot.slane %v2394_v8, 7 }
  0x23   : > { %v2479_v35 = vsel %vm306_vm2, %v3639_v29, %v345_v30  ;;  %v600_v40 = vsel %vm417_vm3, %v2386_v6, %v363_v32  ;;  %v603_v43 = vrot.slane %v2397_v9, 6  ;;  %v605_v44 = vrot.slane %v2489_v39, 5  ;;  %v2507_v48 = vld [vmem:[%s2376_s30 + $0x60] sm:$0xff]  ;;  %v199_v56 = vld [vmem:[%s2376_s30 + $0x48] sm:$0x1]  ;;  %v2793_v28 = vld [vmem:[%s2376_s30 + $0xd0] sm:$0xff] }
  0x24   : > { %2195 = vrot.lane.b32.xlu0 %v2194_v12, %s2285_s4  ;;  %v2502_v45 = vsel %vm306_vm2, %v363_v32, %v364_v33  ;;  %v369_v46 = vrot.slane %v2394_v8, 1  ;;  %v370_v47 = vrot.slane %v2474_v34, 1  ;;  %v607_v49 = vrot.slane %v2496_v41, 4  ;;  %v201_v62 = vld [vmem:[%s2376_s30 + $0x58] sm:$0x1]  ;;  %s2208_s29 = sshll.u32 %s2290_s28, 4  ;;  %s2209_s29 = int_to_ptr.vmem [resolvable:$false] %s2208_s29 }
  0x25   : > { %280 = vrot.lane.b32.xlu1 %v2431_v17, %s2285_s4  ;;  %v602_v50 = vsel %vm420_vm4, %v601_v42, %v600_v40  ;;  %v609_v51 = vrot.slane %v2507_v48, 3  ;;  %v2517_v52 = vsel %vm306_vm2, %v372_v37, %v373_v38  ;;  %v611_v54 = vrot.slane %v2452_v24, 2  ;;  %v203_v12 = vld [vmem:[%s2376_s30 + $0x68] sm:$0x1]  ;;  %v406_v40 = vld [vmem:[%s3630_s2] sm:$0xf]  ;;  %p2211_p1 = scmp.lt.s32.totalorder %s3570_s19, %s2209_s29 }
  0x26   : > { %v604_v53 = vsel %vm423_vm5, %v603_v43, %v602_v50  ;;  %v2528_v57 = vsel %vm220_vm0, -inf, %v2489_v39  ;;  %v2533_v58 = vsel %vm306_vm2, %v369_v46, %v370_v47  ;;  %v290_v60 = vsel %vm225_vm1, -inf, %v2383_v5 }
  0x27   : > { %v606_v55 = vsel %vm426_vm6, %v605_v44, %v604_v53  ;;  %v291_v61 = vsel %vm225_vm1, -inf, %v191_v19  ;;  %v307_v0 = vrot.slane %v290_v60, 1  ;;  %v3638_v7 = vrot.slane %v2489_v39, 1 }
  0x28   : > { %278 = vrot.lane.b32.xlu0 %v2467_v31, %s2285_s4  ;;  %v608_v59 = vsel %vm429_vm7, %v607_v49, %v606_v55  ;;  %v308_v1 = vrot.slane %v291_v61, 1  ;;  %v336_v25 = vrot.slane %v199_v56, 1  ;;  %v3637_v32 = vrot.slane %v2496_v41, 1 }
  0x29   : > { %377 = vrot.lane.b32.xlu1 %v2484_v36, %s2285_s4  ;;  %v610_v63 = vsel %vm432_vm8, %v609_v51, %v608_v59  ;;  %v339_v33 = vrot.slane %v201_v62, 1  ;;  %v3636_v38 = vrot.slane %v2507_v48, 1  ;;  %v342_v43 = vrot.slane %v203_v12, 1 }
  0x2a   : > { %v2548_v22 = vsel %vm434_vm9, %v611_v54, %v610_v63  ;;  %v2555_v19 = vsel %vm306_vm2, %v307_v0, %v308_v1  ;;  %v2565_v42 = vsel %vm306_vm2, %v3638_v7, %v336_v25  ;;  %v464_v47 = vrot.slane %v2484_v36, 7 }
  0x2b   : > { %v2572_v44 = vsel %vm306_vm2, %v3637_v32, %v339_v33  ;;  %v466_v49 = vrot.slane %v2533_v58, 6  ;;  %v2579_v50 = vsel %vm306_vm2, %v3636_v38, %v342_v43  ;;  %v468_v51 = vrot.slane %v2517_v52, 5 }
  0x2c   : > { %375 = vrot.lane.b32.xlu0 %v2502_v45, %s2285_s4  ;;  %3649 = vst [vmem:[#allocation7_spill] sm:$0xff] %v2579_v50  ;;  %v470_v53 = vrot.slane %v2565_v42, 4  ;;  %v472_v54 = vrot.slane %v2572_v44, 3  ;;  %v474_v56 = vrot.slane %v2579_v50, 2  ;;  %v476_v60 = vrot.slane %v2479_v35, 1 }
  0x2d   : > { %381 = vrot.lane.b32.xlu1 %v2517_v52, %s2285_s4  ;;  %v641_v61 = vrot.slane %v2502_v45, 1  ;;  %v643_v63 = vrot.slane %v2533_v58, 7  ;;  %v645_v0 = vrot.slane %v2517_v52, 6  ;;  %v647_v12 = vrot.slane %v2565_v42, 5 }
  0x2e   : > { %v1333_v30 = vrot.slane %v2565_v42, 1  ;;  %v450_v32 = vrot.slane %v2793_v28, 7  ;;  %v1675_v27 = vrot.slane %v2517_v52, 4  ;;  %v1141_v3 = vrot.slane %v2793_v28, 3 }
  0x30   : > { %379 = vrot.lane.b32.xlu0 %v2533_v58, %s2285_s4 }
  0x31   : > { %242 = vrot.lane.b32.xlu1 %v2405_v11, %s2285_s4  ;;  %v465_v11 = vsel %vm417_vm3, %v464_v47, %v2502_v45  ;;  %v651_v47 = vrot.slane %v2579_v50, 3 }
  0x32   : > { %v467_v55 = vsel %vm420_vm4, %v466_v49, %v465_v11  ;;  %v653_v49 = vrot.slane %v2479_v35, 2 }
  0x33   : > { %v469_v59 = vsel %vm423_vm5, %v468_v51, %v467_v55  ;;  %v293_v55 = vsel %vm225_vm1, -inf, %v2411_v13 }
  0x34   : > { %409 = vperm.xlu0 %2199, %v406_v40   ;;  %v471_v62 = vsel %vm426_vm6, %v470_v53, %v469_v59  ;;  %v649_v40 = vrot.slane %v2572_v44, 4  ;;  %v2617_v53 = vsel %vm220_vm0, -inf, %v2496_v41 }
  0x35   : > { %244 = vrot.lane.b32.xlu1 %v2421_v15, %s2285_s4  ;;  %v473_v1 = vsel %vm429_vm7, %v472_v54, %v471_v62  ;;  %v642_v15 = vsel %vm417_vm3, %v2484_v36, %v641_v61  ;;  %v2635_v62 = vsel %vm220_vm0, -inf, %v2452_v24  ;;  %v1166_v54 = vrot.slane %v2479_v35, 5 }
  0x36   : > { %v475_v25 = vsel %vm432_vm8, %v474_v56, %v473_v1  ;;  %v644_v33 = vsel %vm420_vm4, %v643_v63, %v642_v15  ;;  %v296_v1 = vsel %vm225_vm1, -inf, %v2397_v9  ;;  %v297_v15 = vsel %vm225_vm1, -inf, %v2457_v26 }
  0x37   : > { %v2608_v43 = vsel %vm434_vm9, %v476_v60, %v475_v25  ;;  %v311_v60 = vrot.slane %v293_v55, 1  ;;  %v771_v25 = vrot.slane %v2383_v5, 2  ;;  %v782_v55 = vrot.slane %v2452_v24, 3 }
  0x38   : > { %246 = vrot.lane.b32.xlu0 %v2449_v23, %s2285_s4  ;;  %v646_v23 = vsel %vm423_vm5, %v645_v0, %v644_v33  ;;  %v3632_v0 = vmov 0.0   ;;  %v774_v33 = vrot.slane %v2397_v9, 7 }
  0x39   : > { %248 = vrot.lane.b32.xlu1 %v2426_v16, %s2285_s4  ;;  %v648_v51 = vsel %vm426_vm6, %v647_v12, %v646_v23  ;;  %v292_v16 = vsel %vm225_vm1, -inf, %v2386_v6  ;;  %1984 = vmatprep.mubr.msk.f32.mxu0 %vm2287_vm10, %v3632_v0  ;;  %v316_v12 = vrot.slane %v296_v1, 1  ;;  %v776_v23 = vrot.slane %v2489_v39, 6 }
  0x3a   : > { %v650_v11 = vsel %vm429_vm7, %v649_v40, %v648_v51  ;;  %v310_v56 = vrot.slane %v292_v16, 1  ;;  %1997 = vmatprep.mubr.msk.f32.mxu1 %vm2287_vm10, %v3632_v0  ;;  %v317_v40 = vrot.slane %v297_v15, 1  ;;  %v780_v16 = vrot.slane %v2507_v48, 4 }
  0x3b   : > { %v652_v59 = vsel %vm432_vm8, %v651_v47, %v650_v11  ;;  %v772_v47 = vsel %vm417_vm3, %v366_v18, %v771_v25  ;;  %v1326_v0 = vrot.slane %v2502_v45, 5 }
  0x3c   : > { %v2630_v61 = vsel %vm434_vm9, %v653_v49, %v652_v59  ;;  %v2638_v63 = vsel %vm306_vm2, %v310_v56, %v311_v60  ;;  %v778_v49 = vrot.slane %v2496_v41, 5  ;;  %v2660_v51 = vsel %vm306_vm2, %v316_v12, %v317_v40 }
  0x3d   : > { %3650 = vst [vmem:[#allocation8_spill] sm:$0xff] %v2638_v63  ;;  %3651 = vst [vmem:[#allocation9_spill] sm:$0xff] %v2660_v51  ;;  %v773_v26 = vsel %vm420_vm4, %v2394_v8, %v772_v47  ;;  %v942_v56 = vrot.slane %v2383_v5, 3  ;;  %v943_v59 = vrot.slane %v2386_v6, 2  ;;  %v947_v60 = vrot.slane %v2489_v39, 7 }
  0x3e   : > { %v775_v11 = vsel %vm423_vm5, %v774_v33, %v773_v26  ;;  %v949_v12 = vrot.slane %v2496_v41, 6  ;;  %v951_v40 = vrot.slane %v2507_v48, 5  ;;  %v1630_v63 = vrot.slane %v2386_v6, 6 }
  0x3f   : > { %v777_v18 = vsel %vm426_vm6, %v776_v23, %v775_v11  ;;  %v944_v15 = vsel %vm417_vm3, %v943_v59, %v942_v56  ;;  %v812_v11 = vrot.slane %v2502_v45, 2  ;;  %v818_v59 = vrot.slane %v2565_v42, 6 }
  0x40   : > { %v779_v1 = vsel %vm429_vm7, %v778_v49, %v777_v18  ;;  %v945_v33 = vsel %vm420_vm4, %v369_v46, %v944_v15  ;;  %v953_v49 = vrot.slane %v2452_v24, 4  ;;  %v816_v46 = vrot.slane %v2517_v52, 7 }
  0x41   : > { %v781_v25 = vsel %vm432_vm8, %v780_v16, %v779_v1  ;;  %v946_v23 = vsel %vm423_vm5, %v2397_v9, %v945_v33  ;;  %v813_v16 = vrot.slane %v2484_v36, 1  ;;  %v820_v1 = vrot.slane %v2572_v44, 5 }
  0x42   : > { %v2680_v47 = vsel %vm434_vm9, %v782_v55, %v781_v25  ;;  %v948_v26 = vsel %vm426_vm6, %v947_v60, %v946_v23  ;;  %v822_v25 = vrot.slane %v2579_v50, 4  ;;  %v824_v33 = vrot.slane %v2479_v35, 3 }
  0x43   : > { %v950_v56 = vsel %vm429_vm7, %v949_v12, %v948_v26  ;;  %v814_v18 = vsel %vm417_vm3, %v813_v16, %v812_v11  ;;  %v984_v26 = vrot.slane %v2484_v36, 2  ;;  %v989_v16 = vrot.slane %v2565_v42, 7 }
  0x44   : > { %v952_v55 = vsel %vm432_vm8, %v951_v40, %v950_v56  ;;  %v815_v60 = vsel %vm420_vm4, %v2533_v58, %v814_v18  ;;  %v983_v40 = vrot.slane %v2502_v45, 3 }
  0x45   : > { %v2695_v15 = vsel %vm434_vm9, %v953_v49, %v952_v55  ;;  %v817_v12 = vsel %vm423_vm5, %v816_v46, %v815_v60  ;;  %v986_v49 = vrot.slane %v2533_v58, 1  ;;  %v991_v46 = vrot.slane %v2572_v44, 6 }
  0x46   : > { %v819_v23 = vsel %vm426_vm6, %v818_v59, %v817_v12  ;;  %v985_v55 = vsel %vm417_vm3, %v984_v26, %v983_v40  ;;  %v993_v60 = vrot.slane %v2579_v50, 5  ;;  %v995_v12 = vrot.slane %v2479_v35, 4 }
  0x47   : > { %v821_v11 = vsel %vm429_vm7, %v820_v1, %v819_v23  ;;  %v987_v59 = vsel %vm420_vm4, %v986_v49, %v985_v55  ;;  %v294_v40 = vsel %vm225_vm1, -inf, %v2394_v8  ;;  %v295_v26 = vsel %vm225_vm1, -inf, %v2474_v34 }
  0x48   : > { %v823_v56 = vsel %vm432_vm8, %v822_v25, %v821_v11  ;;  %v988_v1 = vsel %vm423_vm5, %v2517_v52, %v987_v59  ;;  %v2722_v25 = vsel %vm220_vm0, -inf, %v2507_v48  ;;  %v313_v49 = vrot.slane %v294_v40, 1 }
  0x49   : > { %v2712_v18 = vsel %vm434_vm9, %v824_v33, %v823_v56  ;;  %3652 = vst [vmem:[#allocation10_spill] sm:$0xff] %v2722_v25  ;;  %v990_v23 = vsel %vm426_vm6, %v989_v16, %v988_v1  ;;  %v314_v56 = vrot.slane %v295_v26, 1  ;;  %v1113_v55 = vrot.slane %v2383_v5, 4 }
  0x4a   : > { %v992_v11 = vsel %vm429_vm7, %v991_v46, %v990_v23  ;;  %v1114_v16 = vrot.slane %v2386_v6, 3  ;;  %v1116_v1 = vrot.slane %v2394_v8, 2  ;;  %v1120_v46 = vrot.slane %v2496_v41, 7 }
  0x4b   : > { %v994_v59 = vsel %vm432_vm8, %v993_v60, %v992_v11  ;;  %v2742_v13 = vsel %vm306_vm2, %v313_v49, %v314_v56  ;;  %v1122_v40 = vrot.slane %v2507_v48, 6  ;;  %v416_v60 = vrot.slane %v2386_v6, 7 }
  0x4c   : > { %v2739_v33 = vsel %vm434_vm9, %v995_v12, %v994_v59  ;;  %3653 = vst [vmem:[#allocation11_spill] sm:$0xff] %v2742_v13  ;;  %v1115_v34 = vsel %vm417_vm3, %v1114_v16, %v1113_v55  ;;  %v1124_v12 = vrot.slane %v2452_v24, 5  ;;  %v419_v56 = vrot.slane %v2394_v8, 6 }
  0x4d   : > { %v1117_v23 = vsel %vm420_vm4, %v1116_v1, %v1115_v34  ;;  %v418_v59 = vsel %vm417_vm3, %v416_v60, %v2383_v5  ;;  %v1154_v1 = vrot.slane %v2502_v45, 4  ;;  %v1157_v34 = vrot.slane %v2533_v58, 2 }
  0x4e   : > { %v1118_v26 = vsel %vm423_vm5, %v372_v37, %v1117_v23  ;;  %v1155_v37 = vrot.slane %v2484_v36, 3  ;;  %v422_v23 = vrot.slane %v2397_v9, 5  ;;  %v1507_v13 = vrot.slane %v2572_v44, 1 }
  0x4f   : > { %v1119_v11 = vsel %vm426_vm6, %v2489_v39, %v1118_v26  ;;  %v421_v26 = vsel %vm420_vm4, %v419_v56, %v418_v59  ;;  %v1510_v25 = vrot.slane %v2479_v35, 7 }
  0x50   : > { %v1121_v49 = vsel %vm429_vm7, %v1120_v46, %v1119_v11  ;;  %v1159_v46 = vrot.slane %v2517_v52, 1  ;;  %v1162_v11 = vrot.slane %v2572_v44, 7  ;;  %v424_v56 = vsel %vm423_vm5, %v422_v23, %v421_v26 }
  0x51   : > { %v1123_v55 = vsel %vm432_vm8, %v1122_v40, %v1121_v49  ;;  %v1156_v40 = vsel %vm417_vm3, %v1155_v37, %v1154_v1  ;;  %v425_v49 = vrot.slane %v2489_v39, 4  ;;  %v1327_v1 = vrot.slane %v2484_v36, 4 }
  0x52   : > { %v2761_v16 = vsel %vm434_vm9, %v1124_v12, %v1123_v55  ;;  %v1158_v60 = vsel %vm420_vm4, %v1157_v34, %v1156_v40  ;;  %v1164_v12 = vrot.slane %v2579_v50, 6  ;;  %v1329_v37 = vrot.slane %v2533_v58, 3 }
  0x53   : > { %3654 = vst [vmem:[#allocation12_spill] sm:$0xff] %v2761_v16  ;;  %v1160_v55 = vsel %vm423_vm5, %v1159_v46, %v1158_v60  ;;  %v1331_v40 = vrot.slane %v2517_v52, 2  ;;  %v428_v46 = vrot.slane %v2496_v41, 3  ;;  %v1328_v23 = vsel %vm417_vm3, %v1327_v1, %v1326_v0  ;;  %v2807_v1 = vld [vmem:[%s2376_s30 + $0xe0] sm:$0xff] }
  0x54   : > { %v1161_v59 = vsel %vm426_vm6, %v2565_v42, %v1160_v55  ;;  %v427_v26 = vsel %vm426_vm6, %v425_v49, %v424_v56  ;;  %v2790_v55 = vld [vmem:[%s2376_s30 + $0xc0] sm:$0xff]  ;;  %v1338_v0 = vrot.slane %v2479_v35, 6  ;;  %v431_v56 = vrot.slane %v2507_v48, 2  ;;  %3656 = vst [vmem:[#allocation14_spill] sm:$0xff] %v2807_v1 }
  0x55   : > { %v1163_v34 = vsel %vm429_vm7, %v1162_v11, %v1161_v59  ;;  %v1330_v11 = vsel %vm420_vm4, %v1329_v37, %v1328_v23  ;;  %v1336_v59 = vrot.slane %v2579_v50, 7  ;;  %v627_v7 = vrot.slane %v2790_v55, 1 }
  0x56   : > { %v1165_v60 = vsel %vm432_vm8, %v1164_v12, %v1163_v34  ;;  %v1332_v12 = vsel %vm423_vm5, %v1331_v40, %v1330_v11  ;;  %v430_v37 = vsel %vm429_vm7, %v428_v46, %v427_v26  ;;  %v452_v34 = vrot.slane %v2807_v1, 6  ;;  %v2826_v26 = vld [vmem:[%s2376_s30 + $0xf0] sm:$0xff] }
  0x57   : > { %v2796_v38 = vsel %vm434_vm9, %v1166_v54, %v1165_v60  ;;  %v1334_v49 = vsel %vm426_vm6, %v1333_v30, %v1332_v12  ;;  %v629_v60 = vrot.slane %v2807_v1, 7  ;;  %v451_v23 = vsel %vm417_vm3, %v450_v32, %v2790_v55 }
  0x58   : > { %3655 = vst [vmem:[#allocation13_spill] sm:$0xff] %v2796_v38  ;;  %v1335_v54 = vsel %vm429_vm7, %v2572_v44, %v1334_v49  ;;  %v628_v30 = vsel %vm417_vm3, %v2793_v28, %v627_v7  ;;  %v433_v29 = vsel %vm432_vm8, %v431_v56, %v430_v37  ;;  %v454_v32 = vrot.slane %v2826_v26, 5 }
  0x59   : > { %v1337_v40 = vsel %vm432_vm8, %v1336_v59, %v1335_v54  ;;  %v631_v54 = vrot.slane %v2826_v26, 6  ;;  %v630_v49 = vsel %vm420_vm4, %v629_v60, %v628_v30  ;;  %v798_v56 = vrot.slane %v2790_v55, 2 }
  0x5a   : > { %v2820_v11 = vsel %vm434_vm9, %v1338_v0, %v1337_v40  ;;  %v453_v40 = vsel %vm420_vm4, %v452_v34, %v451_v23  ;;  %v799_v37 = vrot.slane %v2793_v28, 1  ;;  %v3658_v59 = vrot.slane %v2452_v24, 1 }
  0x5b   : > { %3657 = vst [vmem:[#allocation15_spill] sm:$0xff] %v2820_v11  ;;  %v2848_v0 = vsel %vm225_vm1, -inf, %v2380_v4  ;;  %v1498_v34 = vrot.slane %v2502_v45, 6  ;;  %v1499_v60 = vrot.slane %v2484_v36, 5  ;;  %v2853_v23 = vsel %vm423_vm5, %v454_v32, %v453_v40 }
  0x5c   : > { %v2843_v2 = vsel %vm434_vm9, %v3658_v59, %v433_v29  ;;  %v2856_v30 = vsel %vm423_vm5, %v631_v54, %v630_v49  ;;  %v1501_v12 = vrot.slane %v2533_v58, 4  ;;  %v1503_v29 = vrot.slane %v2517_v52, 3 }
  0x5d   : > { %v2863_v59 = vsel %vm225_vm1, -inf, %v2400_v10  ;;  %v2868_v46 = vsel %vm225_vm1, -inf, %v2431_v17  ;;  %v1500_v32 = vsel %vm417_vm3, %v1499_v60, %v1498_v34  ;;  %v1505_v40 = vrot.slane %v2565_v42, 2 }
  0x5e   : > { %v800_v54 = vsel %vm417_vm3, %v799_v37, %v798_v56  ;;  %v1502_v7 = vsel %vm420_vm4, %v1501_v12, %v1500_v32  ;;  %v969_v11 = vrot.slane %v2790_v55, 3  ;;  %v1285_v38 = vrot.slane %v2383_v5, 5 }
  0x5f   : > { %v1504_v16 = vsel %vm423_vm5, %v1503_v29, %v1502_v7  ;;  %v1286_v34 = vrot.slane %v2386_v6, 4  ;;  %v1670_v49 = vrot.slane %v2502_v45, 7  ;;  %v1671_v56 = vrot.slane %v2484_v36, 6 }
  0x60   : > { %v1506_v60 = vsel %vm426_vm6, %v1505_v40, %v1504_v16  ;;  %v970_v12 = vrot.slane %v2793_v28, 2  ;;  %v1673_v32 = vrot.slane %v2533_v58, 5  ;;  %v972_v7 = vrot.slane %v2807_v1, 1 }
  0x61   : > { %v1508_v37 = vsel %vm429_vm7, %v1507_v13, %v1506_v60  ;;  %v1672_v51 = vsel %vm417_vm3, %v1671_v56, %v1670_v49  ;;  %v1677_v16 = vrot.slane %v2565_v42, 3  ;;  %v1288_v45 = vrot.slane %v2394_v8, 3 }
  0x62   : > { %v1509_v29 = vsel %vm432_vm8, %v2579_v50, %v1508_v37  ;;  %v1674_v13 = vsel %vm420_vm4, %v1673_v32, %v1672_v51  ;;  %v1679_v58 = vrot.slane %v2572_v44, 2  ;;  %v1287_v52 = vsel %vm417_vm3, %v1286_v34, %v1285_v38 }
  0x63   : > { %v2895_v36 = vsel %vm434_vm9, %v1510_v25, %v1509_v29  ;;  %v1457_v40 = vrot.slane %v2383_v5, 6  ;;  %v1676_v60 = vsel %vm423_vm5, %v1675_v27, %v1674_v13  ;;  %v1681_v37 = vrot.slane %v2579_v50, 1 }
  0x64   : > { %3659 = vst [vmem:[#allocation16_spill] sm:$0xff] %v2895_v36  ;;  %v1458_v49 = vrot.slane %v2386_v6, 5  ;;  %v1629_v56 = vrot.slane %v2383_v5, 7  ;;  %v1678_v25 = vsel %vm426_vm6, %v1677_v16, %v1676_v60  ;;  %v971_v32 = vsel %vm417_vm3, %v970_v12, %v969_v11 }
  0x65   : > { %v1290_v38 = vrot.slane %v2397_v9, 2  ;;  %v1680_v34 = vsel %vm429_vm7, %v1679_v58, %v1678_v25  ;;  %v802_v29 = vrot.slane %v2826_v26, 7  ;;  %v1289_v13 = vsel %vm420_vm4, %v1288_v45, %v1287_v52 }
  0x66   : > { %v1682_v5 = vsel %vm432_vm8, %v1681_v37, %v1680_v34  ;;  %v801_v6 = vsel %vm420_vm4, %v2807_v1, %v800_v54  ;;  %v1460_v16 = vrot.slane %v2394_v8, 4  ;;  %v1632_v60 = vrot.slane %v2394_v8, 5 }
  0x67   : > { %v2921_v11 = vsel %vm434_vm9, %v2479_v35, %v1682_v5  ;;  %v973_v58 = vsel %vm420_vm4, %v972_v7, %v971_v32  ;;  %v1459_v25 = vsel %vm417_vm3, %v1458_v49, %v1457_v40  ;;  %v1631_v45 = vsel %vm417_vm3, %v1630_v63, %v1629_v56 }
  0x68   : > { %3660 = vst [vmem:[#allocation17_spill] sm:$0xff] %v2921_v11  ;;  %v1291_v8 = vsel %vm423_vm5, %v1290_v38, %v1289_v13  ;;  %v2933_v5 = vsel %vm423_vm5, %v802_v29, %v801_v6  ;;  %v1462_v12 = vrot.slane %v2397_v9, 3  ;;  %v1634_v7 = vrot.slane %v2397_v9, 4 }
  0x69   : > { %v2939_v63 = vsel %vm423_vm5, %v2826_v26, %v973_v58  ;;  %v2944_v40 = vsel %vm225_vm1, -inf, %v2467_v31  ;;  %v1461_v49 = vsel %vm420_vm4, %v1460_v16, %v1459_v25  ;;  %v1633_v56 = vsel %vm420_vm4, %v1632_v60, %v1631_v45 }
  0x6a   : > { %3661 = vst [vmem:[#allocation18_spill] sm:$0xff] %v2944_v40  ;;  %v3662_v9 = vrot.slane %v2489_v39, 1  ;;  %v1140_v6 = vrot.slane %v2790_v55, 4  ;;  %v1464_v58 = vrot.slane %v2489_v39, 2  ;;  %v1636_v16 = vrot.slane %v2489_v39, 3 }
  0x6b   : > { %v1312_v60 = vrot.slane %v2790_v55, 5  ;;  %v1313_v25 = vrot.slane %v2793_v28, 4  ;;  %v1463_v45 = vsel %vm423_vm5, %v1462_v12, %v1461_v49  ;;  %v1635_v29 = vsel %vm423_vm5, %v1634_v7, %v1633_v56 }
  0x6c   : > { %v1292_v13 = vsel %vm426_vm6, %v3662_v9, %v1291_v8  ;;  %v1294_v8 = vrot.slane %v2507_v48, 7  ;;  %v1296_v9 = vrot.slane %v2452_v24, 6  ;;  %v1638_v32 = vrot.slane %v2496_v41, 2 }
  0x6d   : > { %v1293_v38 = vsel %vm429_vm7, %v2496_v41, %v1292_v13  ;;  %v1484_v34 = vrot.slane %v2790_v55, 6  ;;  %v1485_v39 = vrot.slane %v2793_v28, 5  ;;  %v1656_v37 = vrot.slane %v2790_v55, 7 }
  0x6e   : > { %v1657_v54 = vrot.slane %v2793_v28, 6  ;;  %v1143_v12 = vrot.slane %v2807_v1, 2  ;;  %v1315_v7 = vrot.slane %v2807_v1, 3  ;;  %v1465_v49 = vsel %vm426_vm6, %v1464_v58, %v1463_v45 }
  0x6f   : > { %v1637_v56 = vsel %vm426_vm6, %v1636_v16, %v1635_v29  ;;  %v1142_v52 = vsel %vm417_vm3, %v1141_v3, %v1140_v6  ;;  %v1145_v27 = vrot.slane %v2826_v26, 1  ;;  %v1314_v51 = vsel %vm417_vm3, %v1313_v25, %v1312_v60 }
  0x70   : > { %v1295_v11 = vsel %vm432_vm8, %v1294_v8, %v1293_v38  ;;  %v1317_v36 = vrot.slane %v2826_v26, 2  ;;  %v1487_v50 = vrot.slane %v2807_v1, 4  ;;  %v1659_v40 = vrot.slane %v2807_v1, 5 }
  0x71   : > { %v3663_v58 = vrot.slane %v2496_v41, 1  ;;  %v1639_v16 = vsel %vm429_vm7, %v1638_v32, %v1637_v56  ;;  %v1486_v6 = vsel %vm417_vm3, %v1485_v39, %v1484_v34  ;;  %v1658_v3 = vsel %vm417_vm3, %v1657_v54, %v1656_v37 }
  0x72   : > { %v1144_v25 = vsel %vm420_vm4, %v1143_v12, %v1142_v52  ;;  %v1316_v45 = vsel %vm420_vm4, %v1315_v7, %v1314_v51  ;;  %v2994_v8 = vsel %vm434_vm9, %v1296_v9, %v1295_v11  ;;  %v1468_v41 = vrot.slane %v2452_v24, 7 }
  0x73   : > { %v1466_v29 = vsel %vm429_vm7, %v3663_v58, %v1465_v49  ;;  %3664 = vst [vmem:[#allocation19_spill] sm:$0xff] %v2994_v8  ;;  %v1489_v49 = vrot.slane %v2826_v26, 3  ;;  %v1661_v32 = vrot.slane %v2826_v26, 4  ;;  %v3665_v37 = vrot.slane %v2507_v48, 1 }
  0x74   : > { %v1467_v54 = vsel %vm432_vm8, %v2507_v48, %v1466_v29  ;;  %v1488_v52 = vsel %vm420_vm4, %v1487_v50, %v1486_v6  ;;  %v1660_v51 = vsel %vm420_vm4, %v1659_v40, %v1658_v3  ;;  %v1146_v11 = vsel %vm423_vm5, %v1145_v27, %v1144_v25 }
  0x75   : > { %v1640_v34 = vsel %vm432_vm8, %v3665_v37, %v1639_v16  ;;  %v1318_v9 = vsel %vm423_vm5, %v1317_v36, %v1316_v45  ;;  %v3017_v50 = vsel %vm434_vm9, %v1468_v41, %v1467_v54  ;;  %v1490_v27 = vsel %vm423_vm5, %v1489_v49, %v1488_v52 }
  0x76   : > { %3666 = vst [vmem:[#allocation20_spill] sm:$0xff] %v3017_v50  ;;  %v3021_v36 = vsel %vm434_vm9, %v2452_v24, %v1640_v34  ;;  %v3025_v40 = vsel %vm423_vm5, %v1661_v32, %v1660_v51  ;;  %v3671_v1 = vrot.slane %v2380_v4, 4 }
  0x77   : > { %3667 = vst [vmem:[#allocation21_spill] sm:$0xff] %v3021_v36  ;;  %3668 = vst [vmem:[#allocation22_spill] sm:$0xff] %v3025_v40 }
  0x8f   : > { %v3014_v29 = vpop.permute.xlu1 %274 }
  0x90   : > { %v456_v16 = vrot.slane %v3014_v29, 4  ;;  %v633_v6 = vrot.slane %v3014_v29, 5  ;;  %v804_v3 = vrot.slane %v3014_v29, 6  ;;  %v975_v25 = vrot.slane %v3014_v29, 7 }
  0x91   : > { %v3033_v41 = vsel %vm426_vm6, %v3014_v29, %v1146_v11  ;;  %v1319_v24 = vrot.slane %v3014_v29, 1  ;;  %v1491_v49 = vrot.slane %v3014_v29, 2 }
  0x92   : > { %v2191_v45 = vpop.permute.xlu0 %2190  ;;  %v457_v34 = vsel %vm426_vm6, %v456_v16, %v2853_v23  ;;  %v634_v52 = vsel %vm426_vm6, %v633_v6, %v2856_v30  ;;  %v3050_v11 = vsel %vm426_vm6, %v804_v3, %v2933_v5  ;;  %v3054_v58 = vsel %vm426_vm6, %v975_v25, %v2939_v63 }
  0x93   : > { %v3038_v54 = vunpack.i.h.bf16 %v2191_v45  ;;  %v3040_v37 = vunpack.i.l.bf16 %v2191_v45  ;;  %v3046_v51 = vpop.permute.xlu1 %276  ;;  %v3057_v48 = vsel %vm426_vm6, %v1319_v24, %v1318_v9  ;;  %v3060_v45 = vsel %vm426_vm6, %v1491_v49, %v1490_v27 }
  0x94   : > { %3669 = vst [vmem:[#allocation23_spill] sm:$0xff] %v3057_v48  ;;  %3670 = vst [vmem:[#allocation24_spill] sm:$0xff] %v3060_v45  ;;  %v458_v16 = vrot.slane %v3046_v51, 3  ;;  %v635_v6 = vrot.slane %v3046_v51, 4 }
  0x95   : > { %v436_v23 = vrot.slane %v3038_v54, 7  ;;  %v613_v30 = vrot.slane %v3040_v37, 1  ;;  %v784_v3 = vrot.slane %v3040_v37, 2  ;;  %v785_v63 = vrot.slane %v3038_v54, 1 }
  0x96   : > { %v2196_v5 = vpop.permute.xlu0 %2195  ;;  %v955_v25 = vrot.slane %v3040_v37, 3  ;;  %v956_v9 = vrot.slane %v3038_v54, 2  ;;  %v459_v12 = vsel %vm429_vm7, %v458_v16, %v457_v34  ;;  %v636_v32 = vsel %vm429_vm7, %v635_v6, %v634_v52 }
  0x97   : > { %v3070_v24 = vunpack.i.h.bf16 %v2196_v5  ;;  %v3072_v27 = vunpack.i.l.bf16 %v2196_v5  ;;  %v437_v49 = vsel %vm417_vm3, %v436_v23, %v3040_v37  ;;  %v614_v7 = vsel %vm417_vm3, %v3038_v54, %v613_v30  ;;  %v3078_v56 = vpop.permute.xlu1 %280 }
  0x98   : > { %v786_v39 = vsel %vm417_vm3, %v785_v63, %v784_v3  ;;  %v957_v38 = vsel %vm417_vm3, %v956_v9, %v955_v25  ;;  %v462_v30 = vrot.slane %v3078_v56, 1  ;;  %v639_v34 = vrot.slane %v3078_v56, 2 }
  0x99   : > { %v438_v60 = vrot.slane %v3072_v27, 6  ;;  %v440_v5 = vrot.slane %v3070_v24, 5  ;;  %v615_v13 = vrot.slane %v3072_v27, 7  ;;  %v617_v23 = vrot.slane %v3070_v24, 6 }
  0x9a   : > { %v3088_v36 = vpop.permute.xlu0 %278  ;;  %v787_v52 = vsel %vm420_vm4, %v3072_v27, %v786_v39  ;;  %v788_v16 = vrot.slane %v3070_v24, 7  ;;  %v958_v39 = vrot.slane %v3072_v27, 1 }
  0x9b   : > { %v439_v6 = vsel %vm420_vm4, %v438_v60, %v437_v49  ;;  %v616_v3 = vsel %vm420_vm4, %v615_v13, %v614_v7  ;;  %v460_v63 = vrot.slane %v3088_v36, 2  ;;  %v637_v25 = vrot.slane %v3088_v36, 3  ;;  %v3099_v9 = vpop.permute.xlu1 %377 }
  0x9c   : > { %v441_v50 = vsel %vm423_vm5, %v440_v5, %v439_v6  ;;  %v618_v40 = vsel %vm423_vm5, %v617_v23, %v616_v3  ;;  %v789_v45 = vsel %vm423_vm5, %v788_v16, %v787_v52  ;;  %v3672_v13 = vrot.slane %v2380_v4, 5 }
  0x9d   : > { %v443_v60 = vsel %vm426_vm6, %v3671_v1, %v441_v50  ;;  %v461_v49 = vsel %vm432_vm8, %v460_v63, %v459_v12  ;;  %v638_v8 = vsel %vm432_vm8, %v637_v25, %v636_v32  ;;  %v3673_v5 = vrot.slane %v2400_v10, 3 }
  0x9e   : > { %v620_v7 = vsel %vm426_vm6, %v3672_v13, %v618_v40  ;;  %v3113_v48 = vpop.permute.xlu0 %375  ;;  %v3674_v52 = vrot.slane %v2400_v10, 4  ;;  %v463_v1 = vsel %vm434_vm9, %v462_v30, %v461_v49  ;;  %v640_v50 = vsel %vm434_vm9, %v639_v34, %v638_v8 }
  0x9f   : > { %v445_v23 = vsel %vm429_vm7, %v3673_v5, %v443_v60  ;;  %v3675_v40 = vrot.slane %v2467_v31, 2  ;;  %v3676_v32 = vrot.slane %v2467_v31, 3  ;;  %v2082_v3 = vpack.c.bf16 %v2608_v43, %v463_v1  ;;  %v3131_v25 = vpop.permute.xlu1 %381 }
  0xa0   : > { %v622_v16 = vsel %vm429_vm7, %v3674_v52, %v620_v7  ;;  %v2088_v63 = vpack.c.bf16 %v2630_v61, %v640_v50  ;;  %v3677_v60 = vrot.slane %v2431_v17, 1  ;;  %v3678_v8 = vrot.slane %v2431_v17, 2 }
  0xa1   : > { %v447_v12 = vsel %vm432_vm8, %v3675_v40, %v445_v23  ;;  %v624_v6 = vsel %vm432_vm8, %v3676_v32, %v622_v16  ;;  %v478_v13 = vrot.slane %v3099_v9, 7  ;;  %v655_v7 = vrot.slane %v3113_v48, 1 }
  0xa2   : > { %v449_v30 = vsel %vm434_vm9, %v3677_v60, %v447_v12  ;;  %v626_v34 = vsel %vm434_vm9, %v3678_v8, %v624_v6  ;;  %v482_v61 = vrot.slane %v3131_v25, 5  ;;  %v659_v5 = vrot.slane %v3131_v25, 6  ;;  %v3145_v23 = vpop.permute.xlu0 %379 }
  0xa3   : > { %v2079_v49 = vpack.c.bf16 %v449_v30, %v2843_v2  ;;  %v2085_v43 = vpack.c.bf16 %v626_v34, %v2548_v22  ;;  %v479_v52 = vsel %vm417_vm3, %v478_v13, %v3113_v48  ;;  %v656_v16 = vsel %vm417_vm3, %v3099_v9, %v655_v7  ;;  %v243_v60 = vpop.permute.xlu1 %242 }
  0xa4   : > { %v3679_v1 = vrot.slane %v2380_v4, 6  ;;  %v959_v2 = vsel %vm420_vm4, %v958_v39, %v957_v38  ;;  %v480_v22 = vrot.slane %v3145_v23, 6  ;;  %v657_v40 = vrot.slane %v3145_v23, 7 }
  0xa5   : > { %2080 = vmatpush3.bf16.msra.mxu0 %v2079_v49  ;;  %2086 = vmatpush3.bf16.msra.mxu1 %v2085_v43  ;;  %v3680_v12 = vrot.slane %v2400_v10, 5  ;;  %v960_v6 = vsel %vm423_vm5, %v3070_v24, %v959_v2  ;;  %v3681_v30 = vmov 0.0|0.0   ;;  %v3682_v38 = vrot.slane %v2467_v31, 4 }
  0xa6   : > { %v791_v50 = vsel %vm426_vm6, %v3679_v1, %v789_v45  ;;  %2081 = vmatprep.subr.bf16.mxu0 %v3681_v30  ;;  %2087 = vmatprep.subr.bf16.mxu1 %v3681_v30  ;;  %v3683_v39 = vrot.slane %v2380_v4, 7  ;;  %v806_v34 = vrot.slane %v3046_v51, 5  ;;  %v808_v13 = vrot.slane %v3088_v36, 4 }
  0xa7   : > { %v793_v32 = vsel %vm429_vm7, %v3680_v12, %v791_v50  ;;  %v3684_v7 = vmax.f32 %v2416_v14, %v2528_v57  ;;  %v481_v43 = vsel %vm420_vm4, %v480_v22, %v479_v52  ;;  %v658_v1 = vsel %vm420_vm4, %v657_v40, %v656_v16 }
  0xa8   : > { %v795_v45 = vsel %vm432_vm8, %v3682_v38, %v793_v32  ;;  %v962_v8 = vsel %vm426_vm6, %v3683_v39, %v960_v6  ;;  %v3685_v50 = vrot.slane %v2431_v17, 3  ;;  %v483_v12 = vsel %vm423_vm5, %v482_v61, %v481_v43 }
  0xa9   : > { %v254_v49 = vmax.f32 %v3684_v7, %v243_v60  ;;  %v660_v32 = vsel %vm423_vm5, %v659_v5, %v658_v1  ;;  %v3686_v38 = vrot.slane %v2400_v10, 6  ;;  %2083 = vmatpush3.bf16.msra.mxu0 %v2082_v3  ;;  %2089 = vmatpush3.bf16.msra.mxu1 %v2088_v63  ;;  %v3687_v57 = vrot.slane %v2467_v31, 5 }
  0xaa   : > { %v797_v2 = vsel %vm434_vm9, %v3685_v50, %v795_v45  ;;  %v807_v61 = vsel %vm429_vm7, %v806_v34, %v3050_v11  ;;  %v810_v5 = vrot.slane %v3078_v56, 3  ;;  %v3688_v16 = vmov 0.0  }
  0xab   : > { %v2091_v6 = vpack.c.bf16 %v797_v2, %v2680_v47  ;;  %v964_v39 = vsel %vm429_vm7, %v3686_v38, %v962_v8  ;;  %v262_v14 = vmax.f32 %v254_v49, %v2848_v0  ;;  %v245_v47 = vpop.permute.xlu1 %244  ;;  %1982 = vmatprep.subr.mxu0 %v3688_v16  ;;  %1995 = vmatprep.subr.mxu1 %v3688_v16  ;;  %v3689_v0 = vrot.slane %v2431_v17, 4  ;;  %v3208_v8 = vld [vmem:[%s3629_s1] sm:$0xf] }
  0xac   : > { %v966_v52 = vsel %vm432_vm8, %v3687_v57, %v964_v39  ;;  %v809_v63 = vsel %vm432_vm8, %v808_v13, %v807_v61  ;;  %v977_v22 = vrot.slane %v3046_v51, 6  ;;  %v979_v40 = vrot.slane %v3088_v36, 5 }
  0xad   : > { %v968_v3 = vsel %vm434_vm9, %v3689_v0, %v966_v52  ;;  %v266_v11 = vmax.f32 %v262_v14, %v2790_v55  ;;  %v3690_v60 = vmax.f32 %v2438_v20, %v2617_v53  ;;  %v811_v7 = vsel %vm434_vm9, %v810_v5, %v809_v63  ;;  %1983 = vmatpush3.msk.msra.mxu0 %vm492_vm11, %v483_v12  ;;  %v3692_v0 = vld [vmem:[#allocation8_spill] sm:$0xff] }
  0xae   : > { %v2097_v34 = vpack.c.bf16 %v968_v3, %v2695_v15  ;;  %v2094_v13 = vpack.c.bf16 %v2712_v18, %v811_v7  ;;  %v978_v49 = vsel %vm429_vm7, %v977_v22, %v3054_v58  ;;  %v981_v55 = vrot.slane %v3078_v56, 4  ;;  %1996 = vmatpush3.msk.msra.mxu1 %vm492_vm11, %v660_v32  ;;  %1985 = vmatmul.mubr.msk.f32.vlgmr.msra.gmra.mrb[0].mxu0 %vm488_vm12, %v3208_v8 }
  0xaf   : > { %v255_v45 = vmax.f32 %v3690_v60, %v245_v47  ;;  %v826_v20 = vrot.slane %v3113_v48, 2  ;;  %v286_v53 = vmax.f32 %v266_v11, %v3014_v29  ;;  %v980_v15 = vsel %vm432_vm8, %v979_v40, %v978_v49  ;;  %1998 = vmatmul.mubr.msk.f32.vlgmr.msra.gmra.mrb[0].mxu1 %vm488_vm12, %v3208_v8  ;;  %v249_v58 = vpop.permute.xlu1 %248  ;;  %2090 = vmatprep.subr.bf16.mxu0 %v3681_v30 }
  0xb0   : > { %v827_v18 = vrot.slane %v3099_v9, 1  ;;  %v982_v1 = vsel %vm434_vm9, %v981_v55, %v980_v15  ;;  %v830_v50 = vrot.slane %v3131_v25, 7  ;;  %v998_v2 = vrot.slane %v3099_v9, 2  ;;  %2096 = vmatprep.subr.bf16.mxu1 %v3681_v30  ;;  %2092 = vmatpush3.bf16.msra.mxu0 %v2091_v6  ;;  %v3693_v15 = vld [vmem:[#allocation9_spill] sm:$0xff] }
  0xb1   : > { %v263_v43 = vmax.f32 %v255_v45, %v2863_v59  ;;  %v997_v59 = vrot.slane %v3113_v48, 3  ;;  %v323_v12 = vmax.f32 %v286_v53, %v2555_v19  ;;  %v3691_v38 = vmax.f32 %v2443_v21, %v2635_v62  ;;  %2098 = vmatpush3.bf16.msra.mxu1 %v2097_v34  ;;  %2093 = vmatprep.subr.bf16.mxu0 %v3681_v30 }
  0xb2   : > { %v1000_v14 = vrot.slane %v3145_v23, 1  ;;  %v2100_v57 = vpack.c.bf16 %v2739_v33, %v982_v1  ;;  %v828_v52 = vsel %vm417_vm3, %v827_v18, %v826_v20  ;;  %2099 = vmatprep.subr.bf16.mxu1 %v3681_v30  ;;  %v1127_v21 = vrot.slane %v3038_v54, 3  ;;  %2010 = vmatprep.mubr.msk.f32.mxu0 %vm2287_vm10, %v3688_v16 }
  0xb3   : > { %v267_v32 = vmax.f32 %v263_v43, %v2793_v28  ;;  %v257_v39 = vmax.f32 %v3691_v38, %v249_v58  ;;  %v999_v19 = vsel %vm417_vm3, %v998_v2, %v997_v59  ;;  %v1126_v28 = vrot.slane %v3040_v37, 4  ;;  %2023 = vmatprep.mubr.msk.f32.mxu1 %vm2287_vm10, %v3688_v16  ;;  %v3279_v7 = vpop.permute.xlu0 %409  ;;  %v2200_v58 = vld [vmem:[%s2376_s30 + $0x80] sm:$0xff] }
  0xb4   : > { %v351_v61 = vmax.f32 %v323_v12, %v2565_v42  ;;  %v829_v62 = vsel %vm420_vm4, %v3145_v23, %v828_v52  ;;  %v1001_v33 = vsel %vm420_vm4, %v1000_v14, %v999_v19  ;;  %v1129_v42 = vrot.slane %v3072_v27, 2  ;;  %2095 = vmatpush3.bf16.msra.mxu0 %v2094_v13 }
  0xb5   : > { %v287_v5 = vmax.f32 %v267_v32, %v3046_v51  ;;  %v265_v47 = vmax.f32 %v257_v39, %v2868_v46  ;;  %v1131_v46 = vrot.slane %v3070_v24, 1  ;;  %v831_v22 = vsel %vm423_vm5, %v830_v50, %v829_v62  ;;  %2101 = vmatpush3.bf16.msra.mxu1 %v2100_v57  ;;  %2008 = vmatprep.subr.mxu0 %v3688_v16 }
  0xb6   : > { %v387_v6 = vmax.f32 %v351_v61, %v3113_v48  ;;  %v1002_v40 = vsel %vm423_vm5, %v3131_v25, %v1001_v33  ;;  %v1128_v11 = vsel %vm417_vm3, %v1127_v21, %v1126_v28  ;;  %v1298_v60 = vrot.slane %v3040_v37, 5  ;;  %2021 = vmatprep.subr.mxu1 %v3688_v16  ;;  %v3698_v61 = vld [vmem:[#allocation10_spill] sm:$0xff]  ;;  %v2201_v33 = vld [vmem:[%s2376_s30 + $0x90] sm:$0xff] }
  0xb7   : > { %v324_v3 = vmax.f32 %v287_v5, %v3692_v0  ;;  %v269_v63 = vmax.f32 %v265_v47, %v2826_v26  ;;  %v1299_v45 = vrot.slane %v3038_v54, 4  ;;  %v1130_v13 = vsel %vm420_vm4, %v1129_v42, %v1128_v11  ;;  %v247_v14 = vpop.permute.xlu0 %246  ;;  %v3701_v0 = vld [vmem:[#allocation12_spill] sm:$0xff]  ;;  %v3703_v11 = vld [vmem:[#allocation18_spill] sm:$0xff] }
  0xb8   : > { %1899 = vst.msk [vmem:[%s3273_s11 + $0x20] sm:$0xff] %vm392_vm13, %v387_v6  ;;  %v1301_v49 = vrot.slane %v3072_v27, 3  ;;  %v1132_v55 = vsel %vm423_vm5, %v1131_v46, %v1130_v13  ;;  %v1303_v53 = vrot.slane %v3070_v24, 2  ;;  %2009 = vmatpush3.msk.msra.mxu0 %vm492_vm11, %v831_v22  ;;  %v3694_v59 = vrot.slane %v2400_v10, 7  ;;  %v3705_v13 = vld [vmem:[#allocation23_spill] sm:$0xff] }
  0xb9   : > { %v352_v26 = vmax.f32 %v324_v3, %v2572_v44  ;;  %v289_v34 = vmax.f32 %v269_v63, %v3078_v56  ;;  %v1300_v20 = vsel %vm417_vm3, %v1299_v45, %v1298_v60  ;;  %v1148_v44 = vrot.slane %v3046_v51, 7  ;;  %2022 = vmatpush3.msk.msra.mxu1 %vm492_vm11, %v1002_v40  ;;  %2011 = vmatmul.mubr.msk.f32.vlgmr.msra.gmra.mrb[2].mxu0 %vm488_vm12, %v3208_v8 }
  0xba   : > { %v1133_v1 = vsel %vm426_vm6, %v2200_v58, %v1132_v55  ;;  %v1302_v50 = vsel %vm420_vm4, %v1301_v49, %v1300_v20  ;;  %v1150_v38 = vrot.slane %v3088_v36, 6  ;;  %2024 = vmatmul.mubr.msk.f32.vlgmr.msra.gmra.mrb[2].mxu1 %vm488_vm12, %v3208_v8  ;;  %v3695_v57 = vrot.slane %v2467_v31, 6  ;;  %2102 = vmatprep.subr.bf16.mxu0 %v3681_v30  ;;  %v3706_v55 = vld [vmem:[#allocation19_spill] sm:$0xff] }
  0xbb   : > { %v388_v43 = vmax.f32 %v352_v26, %v3099_v9  ;;  %v326_v18 = vmax.f32 %v289_v34, %v3693_v15  ;;  %v1135_v2 = vsel %vm429_vm7, %v3694_v59, %v1133_v1  ;;  %v1304_v12 = vsel %vm423_vm5, %v1303_v53, %v1302_v50  ;;  %2108 = vmatprep.subr.bf16.mxu1 %v3681_v30  ;;  %v3707_v53 = vld [vmem:[#allocation13_spill] sm:$0xff] }
  0xbc   : > { %v1149_v32 = vsel %vm429_vm7, %v1148_v44, %v3033_v41  ;;  %v1137_v52 = vsel %vm432_vm8, %v3695_v57, %v1135_v2  ;;  %v3696_v19 = vrot.slane %v2380_v4, 1  ;;  %v1152_v28 = vrot.slane %v3078_v56, 5  ;;  %2036 = vmatprep.mubr.msk.f32.mxu0 %vm2287_vm10, %v3688_v16  ;;  %2049 = vmatprep.mubr.msk.f32.mxu1 %vm2287_vm10, %v3688_v16 }
  0xbd   : > { %1900 = vst.msk [vmem:[%s3273_s11 + $0x28] sm:$0xff] %vm392_vm13, %v388_v43  ;;  %v354_v39 = vmax.f32 %v326_v18, %v2479_v35  ;;  %v3697_v35 = vld [vmem:[#allocation6_spill] sm:$0xff]  ;;  %v3700_v21 = vrot.slane %v2431_v17, 5  ;;  %v1322_v46 = vrot.slane %v3088_v36, 7  ;;  %v3702_v63 = vrot.slane %v2467_v31, 7 }
  0xbe   : > { %v1306_v41 = vsel %vm426_vm6, %v3696_v19, %v1304_v12  ;;  %v3699_v5 = vmax.f32 %v3697_v35, %v3698_v61  ;;  %v1151_v40 = vsel %vm432_vm8, %v1150_v38, %v1149_v32  ;;  %v3704_v45 = vrot.slane %v2431_v17, 6  ;;  %v3708_v18 = vld [vmem:[#allocation14_spill] sm:$0xff] }
  0xbf   : > { %v1139_v62 = vsel %vm434_vm9, %v3700_v21, %v1137_v52  ;;  %v1307_v42 = vsel %vm429_vm7, %v2201_v33, %v1306_v41  ;;  %v390_v6 = vmax.f32 %v354_v39, %v3131_v25  ;;  %v1153_v34 = vsel %vm434_vm9, %v1152_v28, %v1151_v40 }
  0xc0   : > { %v256_v47 = vmax.f32 %v3699_v5, %v247_v14  ;;  %v2103_v3 = vpack.c.bf16 %v1139_v62, %v3701_v0  ;;  %v1309_v22 = vsel %vm432_vm8, %v3702_v63, %v1307_v42  ;;  %v1321_v49 = vsel %vm429_vm7, %v3046_v51, %v3705_v13  ;;  %v3709_v14 = vld [vmem:[#allocation15_spill] sm:$0xff] }
  0xc1   : > { %v1311_v26 = vsel %vm434_vm9, %v3704_v45, %v1309_v22  ;;  %1902 = vst.msk [vmem:[%s3273_s11 + $0x38] sm:$0xff] %vm392_vm13, %v390_v6  ;;  %v2106_v44 = vpack.c.bf16 %v3707_v53, %v1153_v34  ;;  %v1323_v43 = vsel %vm432_vm8, %v1322_v46, %v1321_v49  ;;  %v1324_v15 = vrot.slane %v3078_v56, 6  ;;  %v3710_v5 = vld [vmem:[#allocation11_spill] sm:$0xff] }
  0xc2   : > { %v264_v60 = vmax.f32 %v256_v47, %v3703_v11  ;;  %2104 = vmatpush3.bf16.msra.mxu0 %v2103_v3  ;;  %v2109_v20 = vpack.c.bf16 %v1311_v26, %v3706_v55  ;;  %v1168_v1 = vrot.slane %v3113_v48, 4  ;;  %v1169_v50 = vrot.slane %v3099_v9, 3  ;;  %v3711_v3 = vld [vmem:[#allocation7_spill] sm:$0xff] }
  0xc3   : > { %2105 = vmatprep.subr.bf16.mxu0 %v3681_v30  ;;  %v1171_v59 = vrot.slane %v3145_v23, 2  ;;  %v1325_v2 = vsel %vm434_vm9, %v1324_v15, %v1323_v43  ;;  %v1173_v12 = vrot.slane %v3131_v25, 1  ;;  %v1340_v32 = vrot.slane %v3113_v48, 5 }
  0xc4   : > { %v268_v58 = vmax.f32 %v264_v60, %v3708_v18  ;;  %2110 = vmatpush3.bf16.msra.mxu1 %v2109_v20  ;;  %v1341_v38 = vrot.slane %v3099_v9, 4  ;;  %v2112_v57 = vpack.c.bf16 %v3709_v14, %v1325_v2  ;;  %v1170_v52 = vsel %vm417_vm3, %v1169_v50, %v1168_v1  ;;  %v3713_v20 = vld [vmem:[#allocation24_spill] sm:$0xff]  ;;  %v2202_v50 = vld [vmem:[%s2376_s30 + $0xa0] sm:$0xff] }
  0xc5   : > { %2111 = vmatprep.subr.bf16.mxu1 %v3681_v30  ;;  %v1343_v19 = vrot.slane %v3145_v23, 3  ;;  %v1172_v41 = vsel %vm420_vm4, %v1171_v59, %v1170_v52  ;;  %v1345_v35 = vrot.slane %v3131_v25, 2  ;;  %v1470_v61 = vrot.slane %v3040_v37, 6  ;;  %v3720_v52 = vld [vmem:[#allocation16_spill] sm:$0xff] }
  0xc6   : > { %v288_v39 = vmax.f32 %v268_v58, %v3088_v36  ;;  %2107 = vmatpush3.bf16.msra.mxu0 %v2106_v44  ;;  %v1342_v28 = vsel %vm417_vm3, %v1341_v38, %v1340_v32  ;;  %v1174_v21 = vsel %vm423_vm5, %v1173_v12, %v1172_v41  ;;  %v1471_v33 = vrot.slane %v3038_v54, 5  ;;  %v3714_v44 = vld [vmem:[#allocation22_spill] sm:$0xff]  ;;  %v3721_v41 = vld [vmem:[#allocation20_spill] sm:$0xff] }
  0xc7   : > { %2034 = vmatprep.subr.mxu0 %v3688_v16  ;;  %v1344_v62 = vsel %vm420_vm4, %v1343_v19, %v1342_v28  ;;  %v1473_v46 = vrot.slane %v3072_v27, 4  ;;  %v1475_v6 = vrot.slane %v3070_v24, 3  ;;  %v1642_v0 = vrot.slane %v3040_v37, 7 }
  0xc8   : > { %v325_v47 = vmax.f32 %v288_v39, %v3710_v5  ;;  %2113 = vmatpush3.bf16.msra.mxu1 %v2112_v57  ;;  %v1346_v42 = vsel %vm423_vm5, %v1345_v35, %v1344_v62  ;;  %v1472_v22 = vsel %vm417_vm3, %v1471_v33, %v1470_v61  ;;  %v1643_v40 = vrot.slane %v3038_v54, 6  ;;  %v2203_v5 = vld [vmem:[%s2376_s30 + $0xb0] sm:$0xff]  ;;  %s2210_s30 = scalar_lea.vmem %s2209_s29, 2048 }
  0xc9   : > { %2047 = vmatprep.subr.mxu1 %v3688_v16  ;;  %v1645_v11 = vrot.slane %v3072_v27, 5  ;;  %v1474_v60 = vsel %vm420_vm4, %v1473_v46, %v1472_v22  ;;  %v1647_v45 = vrot.slane %v3070_v24, 4  ;;  %v1493_v26 = vrot.slane %v3046_v51, 1  ;;  %p2212_p2 = scmp.lt.s32.totalorder %s2210_s30, %s2204_s27 }
  0xca   : > { %v353_v63 = vmax.f32 %v325_v47, %v3711_v3  ;;  %2035 = vmatpush3.msk.msra.mxu0 %vm492_vm11, %v1174_v21  ;;  %v1496_v37 = vrot.slane %v3078_v56, 7  ;;  %v1476_v54 = vsel %vm423_vm5, %v1475_v6, %v1474_v60  ;;  %v1644_v27 = vsel %vm417_vm3, %v1643_v40, %v1642_v0  ;;  %v3723_v21 = vld [vmem:[#allocation17_spill] sm:$0xff] }
  0xcb   : > { %2037 = vmatmul.mubr.msk.f32.vlgmr.msra.gmra.mrb[4].mxu0 %vm488_vm12, %v3208_v8  ;;  %2114 = vmatprep.subr.bf16.mxu0 %v3681_v30  ;;  %v1665_v13 = vrot.slane %v3046_v51, 2  ;;  %v3712_v24 = vrot.slane %v2380_v4, 2  ;;  %v1646_v55 = vsel %vm420_vm4, %v1645_v11, %v1644_v27  ;;  %v1494_v53 = vsel %vm429_vm7, %v1493_v26, %v3713_v20  ;;  %p2213_p3 = por %p2212_p2, %p2211_p1 }
  0xcc   : > { %v389_v34 = vmax.f32 %v353_v63, %v3145_v23  ;;  %2048 = vmatpush3.msk.msra.mxu1 %vm492_vm11, %v1346_v42  ;;  %v3715_v43 = vrot.slane %v3014_v29, 3  ;;  %v3716_v51 = vrot.slane %v2400_v10, 1  ;;  %v1648_v58 = vsel %vm423_vm5, %v1647_v45, %v1646_v55  ;;  %2062 = vmatprep.mubr.msk.f32.mxu0 %vm2287_vm10, %v3688_v16  ;;  %v3724_v42 = vld [vmem:[#allocation21_spill] sm:$0xff] }
  0xcd   : > { %v1478_v49 = vsel %vm426_vm6, %v3712_v24, %v1476_v54  ;;  %2050 = vmatmul.mubr.msk.f32.vlgmr.msra.gmra.mrb[4].mxu1 %vm488_vm12, %v3208_v8  ;;  %2120 = vmatprep.subr.bf16.mxu1 %v3681_v30  ;;  %v1495_v1 = vsel %vm432_vm8, %v3088_v36, %v1494_v53  ;;  %v1667_v29 = vrot.slane %v3088_v36, 1  ;;  %v3717_v2 = vrot.slane %v2380_v4, 3  ;;  %p2214_p5 = pnand %p2213_p3, %p2207_p0 }
  0xce   : > { %v1664_v15 = vsel %vm426_vm6, %v3715_v43, %v3714_v44  ;;  %1901 = vst.msk [vmem:[%s3273_s11 + $0x30] sm:$0xff] %vm392_vm13, %v389_v34  ;;  %v1480_v18 = vsel %vm429_vm7, %v3716_v51, %v1478_v49  ;;  %v1497_v32 = vsel %vm434_vm9, %v1496_v37, %v1495_v1  ;;  %v3718_v39 = vrot.slane %v2431_v17, 7  ;;  %2075 = vmatprep.mubr.msk.f32.mxu1 %vm2287_vm10, %v3688_v16 }
  0xcf   : > { %v1481_v59 = vsel %vm432_vm8, %v2202_v50, %v1480_v18  ;;  %v1650_v12 = vsel %vm426_vm6, %v3717_v2, %v1648_v58  ;;  %v1666_v38 = vsel %vm429_vm7, %v1665_v13, %v1664_v15  ;;  %v3719_v36 = vrot.slane %v2400_v10, 2 }
  0xd0   : > { %v1483_v14 = vsel %vm434_vm9, %v3718_v39, %v1481_v59  ;;  %v2118_v19 = vpack.c.bf16 %v3720_v52, %v1497_v32  ;;  %v1668_v4 = vsel %vm432_vm8, %v1667_v29, %v1666_v38  ;;  %v3722_v35 = vrot.slane %v2467_v31, 1 }
  0xd1   : > { %v1652_v57 = vsel %vm429_vm7, %v3719_v36, %v1650_v12  ;;  %v2115_v28 = vpack.c.bf16 %v1483_v14, %v3721_v41  ;;  %v1669_v17 = vsel %vm434_vm9, %v3078_v56, %v1668_v4  ;;  %v1512_v10 = vrot.slane %v3113_v48, 6 }
  0xd2   : > { %v1654_v61 = vsel %vm432_vm8, %v3722_v35, %v1652_v57  ;;  %v2124_v62 = vpack.c.bf16 %v3723_v21, %v1669_v17  ;;  %v1513_v33 = vrot.slane %v3099_v9, 5  ;;  %v1515_v6 = vrot.slane %v3145_v23, 4 }
  0xd3   : > { %v1655_v47 = vsel %vm434_vm9, %v2203_v5, %v1654_v61  ;;  %2116 = vmatpush3.bf16.msra.mxu0 %v2115_v28  ;;  %v1684_v31 = vrot.slane %v3113_v48, 7  ;;  %v1685_v0 = vrot.slane %v3099_v9, 6  ;;  %v1687_v3 = vrot.slane %v3145_v23, 5 }
  0xd4   : > { %v2121_v46 = vpack.c.bf16 %v1655_v47, %v3724_v42  ;;  %2117 = vmatprep.subr.bf16.mxu0 %v3681_v30  ;;  %v1514_v56 = vsel %vm417_vm3, %v1513_v33, %v1512_v10  ;;  %v1517_v63 = vrot.slane %v3131_v25, 3  ;;  %v1689_v48 = vrot.slane %v3131_v25, 4 }
  0xd5   : > { %v1686_v22 = vsel %vm417_vm3, %v1685_v0, %v1684_v31  ;;  %v1516_v40 = vsel %vm420_vm4, %v1515_v6, %v1514_v56  ;;  %v2289_v25 = vmov 1966171168  }
  0xd6   : > { %2122 = vmatpush3.bf16.msra.mxu1 %v2121_v46  ;;  %v1688_v9 = vsel %vm420_vm4, %v1687_v3, %v1686_v22  ;;  %v1518_v23 = vsel %vm423_vm5, %v1517_v63, %v1516_v40  ;;  %v568_v11 = vunpack.c.l.s4 %v2289_v25 }
  0xd7   : > { %2123 = vmatprep.subr.bf16.mxu1 %v3681_v30  ;;  %2119 = vmatpush3.bf16.msra.mxu0 %v2118_v19  ;;  %v1690_v30 = vsel %vm423_vm5, %v1689_v48, %v1688_v9 }
  0xd8   : > { %2060 = vmatprep.subr.mxu0 %v3688_v16  ;;  %v569_v60 = vunpack.c.0.s8 %v568_v11 }
  0xda   : > { %2125 = vmatpush3.bf16.msra.mxu1 %v2124_v62 }
  0xdb   : > { %2073 = vmatprep.subr.mxu1 %v3688_v16  ;;  %2061 = vmatpush3.msk.msra.mxu0 %vm492_vm11, %v1518_v23  ;;  %v3725_v16 = vld [vmem:[#allocation5_spill] sm:$0xff] }
  0xdc   : > { %2063 = vmatmul.mubr.msk.f32.vlgmr.msra.gmra.mrb[6].mxu0 %vm488_vm12, %v3208_v8  ;;  %v3473_v37 = vsub.s32 %v569_v60, %v3725_v16 }
  0xde   : > { %2074 = vmatpush3.msk.msra.mxu1 %vm492_vm11, %v1690_v30 }
  0xdf   : > { %2076 = vmatmul.mubr.msk.f32.vlgmr.msra.gmra.mrb[6].mxu1 %vm488_vm12, %v3208_v8 }
 0x181   : > { %v561_v45 = vpop.f32.mrb[0].mxu0 }
 0x182   : > { %v733_v26 = vpop.f32.mrb[0].mxu1  ;;  %v562_v34 = vadd.f32 %v561_v45, %v3279_v7  ;;  %v1986_v27 = vpop.f32.mrb[1].mxu0 }
 0x183   : > { %v734_v54 = vadd.f32 %v733_v26, %v3279_v7  ;;  %v1999_v13 = vpop.f32.mrb[1].mxu1 }
 0x184   : > { %v565_v24 = vmax.f32 %v562_v34, 0.0 }
 0x185   : > { %v737_v49 = vmax.f32 %v734_v54, 0.0 }
 0x186   : > { %v573_v8 = vrot.slane %v565_v24, %v3473_v37 }
 0x187   : > { %v745_v55 = vrot.slane %v737_v49, %v3473_v37 }
 0x188   : > { %v574_v20 = vcombine.high %v573_v8, %v573_v8  ;;  %v581_v53 = vrot.slane %v573_v8, %v3473_v37 }
 0x189   : > { %v746_v44 = vcombine.high %v745_v55, %v745_v55  ;;  %v753_v43 = vrot.slane %v745_v55, %v3473_v37 }
 0x18a   : > { %v588_v15 = vrot.slane %v574_v20, %v3473_v37  ;;  %v589_v51 = vcombine.high %v581_v53, %v581_v53  ;;  %596 = vst.msk [vmem:[%s3273_s11] sm:$0x1] %vm595_vm14, %v581_v53 }
 0x18b   : > { %v760_v18 = vrot.slane %v746_v44, %v3473_v37  ;;  %v761_v58 = vcombine.high %v753_v43, %v753_v43  ;;  %767 = vst.msk [vmem:[%s3273_s11 + $0x1] sm:$0x1] %vm595_vm14, %v753_v43 }
 0x18c   : > { %v590_v1 = vcombine.high %v588_v15, %v588_v15  ;;  %597 = vst.msk [vmem:[%s3273_s11 + $0x8] sm:$0x1] %vm595_vm14, %v588_v15  ;;  %598 = vst.msk [vmem:[%s3273_s11 + $0x10] sm:$0x1] %vm595_vm14, %v589_v51  ;;  %v904_v50 = vpop.f32.mrb[2].mxu0 }
 0x18d   : > { %v762_v29 = vcombine.high %v760_v18, %v760_v18  ;;  %768 = vst.msk [vmem:[%s3273_s11 + $0x9] sm:$0x1] %vm595_vm14, %v760_v18  ;;  %769 = vst.msk [vmem:[%s3273_s11 + $0x11] sm:$0x1] %vm595_vm14, %v761_v58  ;;  %v1075_v59 = vpop.f32.mrb[2].mxu1  ;;  %v905_v2 = vadd.f32 %v904_v50, %v3279_v7  ;;  %v2012_v32 = vpop.f32.mrb[3].mxu0 }
 0x18e   : > { %v1076_v12 = vadd.f32 %v1075_v59, %v3279_v7  ;;  %v2025_v38 = vpop.f32.mrb[3].mxu1  ;;  %599 = vst.msk [vmem:[%s3273_s11 + $0x18] sm:$0x1] %vm595_vm14, %v590_v1 }
 0x18f   : > { %770 = vst.msk [vmem:[%s3273_s11 + $0x19] sm:$0x1] %vm595_vm14, %v762_v29  ;;  %v908_v39 = vmax.f32 %v905_v2, 0.0 }
 0x190   : > { %v1079_v14 = vmax.f32 %v1076_v12, 0.0 }
 0x191   : > { %v916_v36 = vrot.slane %v908_v39, %v3473_v37 }
 0x192   : > { %v1087_v57 = vrot.slane %v1079_v14, %v3473_v37 }
 0x193   : > { %v917_v52 = vcombine.high %v916_v36, %v916_v36  ;;  %v924_v19 = vrot.slane %v916_v36, %v3473_v37 }
 0x194   : > { %v1088_v4 = vcombine.high %v1087_v57, %v1087_v57  ;;  %v1095_v41 = vrot.slane %v1087_v57, %v3473_v37 }
 0x195   : > { %v931_v28 = vrot.slane %v917_v52, %v3473_v37  ;;  %v932_v35 = vcombine.high %v924_v19, %v924_v19  ;;  %938 = vst.msk [vmem:[%s3273_s11 + $0x2] sm:$0x1] %vm595_vm14, %v924_v19 }
 0x196   : > { %v1102_v61 = vrot.slane %v1088_v4, %v3473_v37  ;;  %v1103_v17 = vcombine.high %v1095_v41, %v1095_v41  ;;  %1109 = vst.msk [vmem:[%s3273_s11 + $0x3] sm:$0x1] %vm595_vm14, %v1095_v41 }
 0x197   : > { %v933_v10 = vcombine.high %v931_v28, %v931_v28  ;;  %939 = vst.msk [vmem:[%s3273_s11 + $0xa] sm:$0x1] %vm595_vm14, %v931_v28  ;;  %940 = vst.msk [vmem:[%s3273_s11 + $0x12] sm:$0x1] %vm595_vm14, %v932_v35 }
 0x198   : > { %v1104_v5 = vcombine.high %v1102_v61, %v1102_v61  ;;  %1110 = vst.msk [vmem:[%s3273_s11 + $0xb] sm:$0x1] %vm595_vm14, %v1102_v61  ;;  %1111 = vst.msk [vmem:[%s3273_s11 + $0x13] sm:$0x1] %vm595_vm14, %v1103_v17 }
 0x199   : > { %941 = vst.msk [vmem:[%s3273_s11 + $0x1a] sm:$0x1] %vm595_vm14, %v933_v10 }
 0x19a   : > { %1112 = vst.msk [vmem:[%s3273_s11 + $0x1b] sm:$0x1] %vm595_vm14, %v1104_v5 }
 0x19e   : > { %v1247_v47 = vpop.f32.mrb[4].mxu0 }
 0x19f   : > { %v1248_v21 = vadd.f32 %v1247_v47, %v3279_v7  ;;  %v2038_v62 = vpop.f32.mrb[5].mxu0 }
 0x1a0   : > { %v1419_v33 = vpop.f32.mrb[4].mxu1 }
 0x1a1   : > { %v1251_v42 = vmax.f32 %v1248_v21, 0.0  ;;  %v1420_v46 = vadd.f32 %v1419_v33, %v3279_v7  ;;  %v2051_v6 = vpop.f32.mrb[5].mxu1 }
 0x1a3   : > { %v1259_v31 = vrot.slane %v1251_v42, %v3473_v37  ;;  %v1423_v0 = vmax.f32 %v1420_v46, 0.0 }
 0x1a5   : > { %v1260_v56 = vcombine.high %v1259_v31, %v1259_v31  ;;  %v1267_v3 = vrot.slane %v1259_v31, %v3473_v37  ;;  %v1431_v63 = vrot.slane %v1423_v0, %v3473_v37 }
 0x1a7   : > { %v1274_v22 = vrot.slane %v1260_v56, %v3473_v37  ;;  %v1275_v40 = vcombine.high %v1267_v3, %v1267_v3  ;;  %1281 = vst.msk [vmem:[%s3273_s11 + $0x4] sm:$0x1] %vm595_vm14, %v1267_v3  ;;  %v1432_v48 = vcombine.high %v1431_v63, %v1431_v63  ;;  %v1439_v9 = vrot.slane %v1431_v63, %v3473_v37 }
 0x1a9   : > { %v1276_v23 = vcombine.high %v1274_v22, %v1274_v22  ;;  %1282 = vst.msk [vmem:[%s3273_s11 + $0xc] sm:$0x1] %vm595_vm14, %v1274_v22  ;;  %1283 = vst.msk [vmem:[%s3273_s11 + $0x14] sm:$0x1] %vm595_vm14, %v1275_v40  ;;  %v1446_v30 = vrot.slane %v1432_v48, %v3473_v37  ;;  %v1447_v25 = vcombine.high %v1439_v9, %v1439_v9 }
 0x1aa   : > { %1453 = vst.msk [vmem:[%s3273_s11 + $0x5] sm:$0x1] %vm595_vm14, %v1439_v9 }
 0x1ab   : > { %1284 = vst.msk [vmem:[%s3273_s11 + $0x1c] sm:$0x1] %vm595_vm14, %v1276_v23  ;;  %v1448_v11 = vcombine.high %v1446_v30, %v1446_v30  ;;  %1454 = vst.msk [vmem:[%s3273_s11 + $0xd] sm:$0x1] %vm595_vm14, %v1446_v30 }
 0x1ac   : > { %1455 = vst.msk [vmem:[%s3273_s11 + $0x15] sm:$0x1] %vm595_vm14, %v1447_v25 }
 0x1ad   : > { %1456 = vst.msk [vmem:[%s3273_s11 + $0x1d] sm:$0x1] %vm595_vm14, %v1448_v11 }
 0x1af   : > { %v1591_v60 = vpop.f32.mrb[6].mxu0 }
 0x1b0   : > { %v1592_v45 = vadd.f32 %v1591_v60, %v3279_v7  ;;  %v2064_v26 = vpop.f32.mrb[7].mxu0 }
 0x1b2   : > { %v1763_v16 = vpop.f32.mrb[6].mxu1  ;;  %v1595_v34 = vmax.f32 %v1592_v45, 0.0 }
 0x1b3   : > { %v1764_v54 = vadd.f32 %v1763_v16, %v3279_v7  ;;  %v2077_v27 = vpop.f32.mrb[7].mxu1 }
 0x1b4   : > { %v1603_v13 = vrot.slane %v1595_v34, %v3473_v37 }
 0x1b5   : > { %v1767_v24 = vmax.f32 %v1764_v54, 0.0 }
 0x1b6   : > { %v1604_v49 = vcombine.high %v1603_v13, %v1603_v13  ;;  %v1611_v8 = vrot.slane %v1603_v13, %v3473_v37 }
 0x1b7   : > { %v1775_v55 = vrot.slane %v1767_v24, %v3473_v37 }
 0x1b8   : > { %v1618_v20 = vrot.slane %v1604_v49, %v3473_v37  ;;  %v1619_v53 = vcombine.high %v1611_v8, %v1611_v8  ;;  %1625 = vst.msk [vmem:[%s3273_s11 + $0x6] sm:$0x1] %vm595_vm14, %v1611_v8 }
 0x1b9   : > { %v1776_v7 = vcombine.high %v1775_v55, %v1775_v55  ;;  %v1783_v44 = vrot.slane %v1775_v55, %v3473_v37 }
 0x1ba   : > { %v1620_v43 = vcombine.high %v1618_v20, %v1618_v20  ;;  %1626 = vst.msk [vmem:[%s3273_s11 + $0xe] sm:$0x1] %vm595_vm14, %v1618_v20  ;;  %1627 = vst.msk [vmem:[%s3273_s11 + $0x16] sm:$0x1] %vm595_vm14, %v1619_v53 }
 0x1bb   : > { %v1790_v15 = vrot.slane %v1776_v7, %v3473_v37  ;;  %v1791_v51 = vcombine.high %v1783_v44, %v1783_v44  ;;  %1797 = vst.msk [vmem:[%s3273_s11 + $0x7] sm:$0x1] %vm595_vm14, %v1783_v44 }
 0x1bc   : > { %1628 = vst.msk [vmem:[%s3273_s11 + $0x1e] sm:$0x1] %vm595_vm14, %v1620_v43 }
 0x1bd   : > { %v1792_v18 = vcombine.high %v1790_v15, %v1790_v15  ;;  %1798 = vst.msk [vmem:[%s3273_s11 + $0xf] sm:$0x1] %vm595_vm14, %v1790_v15  ;;  %1799 = vst.msk [vmem:[%s3273_s11 + $0x17] sm:$0x1] %vm595_vm14, %v1791_v51 }
 0x1bf   : > { %1800 = vst.msk [vmem:[%s3273_s11 + $0x1f] sm:$0x1] %vm595_vm14, %v1792_v18 }
 0x1c0   : > { %2217 = shalt.err (!%p2214_p5)
}
 0x1c1   : > { %s2218_s4 = scalar_lea.hbm %s3568_s26, 1024  ;;  %s2222_s7 = scalar_lea.hbm %s3631_s3, 2048 }
 0x1c2   : > { %p2219_p6 = scmp.ne.s32.totalorder %s3568_s26, %s2218_s4  ;;  %p2223_p10 = scmp.lt.u32.totalorder %s3568_s26, %s3631_s3 }
 0x1c3   : > { %p2224_p11 = scmp.lt.u32.totalorder %s2222_s7, %s2218_s4  ;;  %p2226_p13 = scmp.lt.u32.totalorder %s2218_s4, %s3568_s26 }
 0x1c4   : > { %p2220_p7 = pnand %p2219_p6, %p2353_p4 }
 0x1c5   : > { %p2225_p12 = por %p2224_p11, %p2223_p10 }
 0x1c6   : > { %p2221_p9 = pneg %p2220_p7 }
 0x1c7   : > { %p2227_p0 = por %p2226_p13, %p2225_p12 }
 0x1c9   : > { %p2228_p1 = pnand %p2227_p0, %p2221_p9 }
 0x1cb   : > { %2231 = shalt.err (!%p2228_p1)
}
 0x1cc   : > { %s2291_s10 = smov 128   ;;  %s2292_s11 = smov 8  }
 0x1cd   : > { %2126 = dma.vmem_to_hbm [thread:$0]  (%p2353_p4), %s3570_s19, 1024, %s3568_s26, %s3582_s15, %s2291_s10, %s2291_s10, %s2292_s11  }
 0x1ce PF: > { %p2132_p2 = scmp.ge.s32.totalorder %s2282_s17, 2  ;;  %s1831_s18 = sand.u32 1, %s2262_s12  }
 0x1cf   : > { %s1832_s21 = scalar_lea.sflag [#allocation3], %s1831_s18 }
 0x1d0   : > { %p2129_p3 = pnand %p2132_p2, %p2360_p8 }
 0x1d2   : > { %2257 = dma.done.wait (!%p2129_p3), %s1832_s21, 1024  }
 0x1d3   : > { %2259 = vsyncadd (!%p2129_p3), %s1832_s21, 4294966272  ;;  %s16_s17 = sadd.s32 1, %s2282_s17   ;;  %s3726_s12 = smov %s2266_s13 }
 0x1d4   : > { %p13_p5 = scmp.ge.s32.totalorder %s16_s17, 4   ;;  %s3727_s13 = smov %s2270_s14 }
 0x1d5   : > { %s3728_s14 = smov %s2366_s25  ;;  %s3729_s15 = smov %s2278_s16 }
 0x1d6   : > { %s3730_s16 = smov %s3732_s20  ;;  %15 = sbr.rel (!%p13_p5) target bundleno = 4 (0x4), region = 69 }
 0x1dd   :  { %1837 = vsyncpa [#allocation3], 1 }
 0x1de   :  { %1839 = vsyncpa [#allocation3 + $0x1], 1 }

</bundles_post_ra>
